<compile_context>
chip_gen: v7x
topology: tpu7x:2x2x1
jax: 0.10.0
libtpu: 0.0.40
codegen_flags: <defaults>
</compile_context>

<pallas_src>
import jax
import jax.numpy as jnp
from jax.experimental import pallas as pl
from jax.experimental.pallas import tpu as pltpu


MATMUL_DTYPE = jnp.bfloat16   # MXU-native path on v5e/v6e/v7x; accumulation stays f32.


# ------------------------------ fused kernel -------------------------------- #

def _decoder_block_kernel(x_ref, skip_ref, wup_ref, upb_ref,
                          wt1_ref, c1b_ref, wt2_ref, c2b_ref,
                          o_ref, pcomb, pz1):
    """Whole DecoderBlock forward for one batch element (grid axis 0 = batch).

    Lane-merged layouts (last dim = lane axis):
      x_ref    (1, 2H, W*Cin)        input rows pre-duplicated (row r holds x[r // 2])
      skip_ref (1, 2H, 2W*Cs)
      pcomb    (2H+2, 2W*(Cout+Cs))  padded [up | skip] image; rows 0 / last = zero pad
      pz1      (2H+2, 2W*Cout)       padded conv1 output
      o_ref    (1, 2H, 2W*Cout)
    """
    H2 = x_ref.shape[1]
    WCo = o_ref.shape[2]           # 2W * Cout  (= 128 at the toy size -> lane-dense)
    Lsk = skip_ref.shape[2]        # 2W * Cs
    L1 = pcomb.shape[1]            # 2W * (Cout + Cs)
    Hp = pcomb.shape[0]            # 2H + 2

    # Zero only the vertical zero-pad rows (interiors are fully overwritten below).
    # Done every step (4 tiny row stores) so it is megacore-safe under "parallel".
    pcomb[pl.ds(0, 1), :] = jnp.zeros((1, L1), pcomb.dtype)
    pcomb[pl.ds(Hp - 1, 1), :] = jnp.zeros((1, L1), pcomb.dtype)
    pz1[pl.ds(0, 1), :] = jnp.zeros((1, WCo), pz1.dtype)
    pz1[pl.ds(Hp - 1, 1), :] = jnp.zeros((1, WCo), pz1.dtype)

    # ---- ConvTranspose2d(k=2, s=2): one matmul + per-row-parity lane select ----
    # wup columns: [kh=0 row content (WCo) | kh=1 row content (WCo)]; output row r
    # comes from input row r//2 with kernel row kh = r % 2.
    y2 = jnp.dot(x_ref[0], wup_ref[...], preferred_element_type=jnp.float32)  # (H2, 2*WCo)
    parity = jax.lax.broadcasted_iota(jnp.int32, (H2, 1), 0) % 2
    y = jnp.where(parity == 0, y2[:, :WCo], y2[:, WCo:]) + upb_ref[...]       # f32
    pcomb[pl.ds(1, H2), pl.ds(0, WCo)] = y.astype(pcomb.dtype)

    # ---- torch.cat([up, skip], channel) == writing skip into the tail lanes ----
    pcomb[pl.ds(1, H2), pl.ds(WCo, Lsk)] = skip_ref[0]

    # ---- conv1 (3x3, SAME) + ReLU: 3 accumulating matmuls (one per row tap) ----
    acc = jnp.zeros((H2, WCo), jnp.float32)
    for dh in range(3):
        acc = acc + jnp.dot(pcomb[pl.ds(dh, H2), :], wt1_ref[dh],
                            preferred_element_type=jnp.float32)
    z1 = jnp.maximum(acc + c1b_ref[...], 0.0)
    pz1[pl.ds(1, H2), :] = z1.astype(pz1.dtype)

    # ---- conv2 (3x3, SAME) + ReLU ----
    acc = jnp.zeros((H2, WCo), jnp.float32)
    for dh in range(3):
        acc = acc + jnp.dot(pz1[pl.ds(dh, H2), :], wt2_ref[dh],
                            preferred_element_type=jnp.float32)
    o_ref[0] = jnp.maximum(acc + c2b_ref[...], 0.0).astype(o_ref.dtype)


# ------------------------------ op wrappers --------------------------------- #

def _width_toeplitz(conv_w, W2, mm_dt):
    """(3,3,CI,CO) HWIO conv weight -> (3, W2*CI, W2*CO) width-banded matmul operand.

    Tap dh, row q*CI+ci, col wo*CO+co holds conv_w[dh, q-wo+1, ci, co] (zero outside
    the 3-wide band), so horizontal SAME padding is folded into the weight.
    """
    CI, CO = conv_w.shape[2], conv_w.shape[3]
    q = jnp.arange(W2)
    band = (q[:, None, None] == (q[None, :, None] + jnp.arange(3)[None, None, :] - 1))
    band = band.astype(jnp.float32)                                   # (q, wo, dw)
    t = jnp.einsum('qwd,hdio->hqiwo', band, conv_w.astype(jnp.float32))
    return t.reshape(3, W2 * CI, W2 * CO).astype(mm_dt)


def decoder_block_nhwc(x, skip, params):
    """x: (N,H,W,Cin), skip: (N,2H,2W,Cs) NHWC -> (N,2H,2W,Cout) NHWC."""
    N, H, W, Cin = x.shape
    Ns, H2, W2, Cs = skip.shape
    assert Ns == N and H2 == 2 * H and W2 == 2 * W
    Cout = params["up_b"].shape[0]
    WCo = W2 * Cout
    mm_dt = MATMUL_DTYPE

    # --- host-side weight prep (traced once under jit; precompute offline in prod) ---
    # Deconv weight -> (W*Cin, 2*WCo): column block kh holds the full output row of
    # parity kh, lanes ordered (output col, out channel); block-diagonal over w.
    sel = (jnp.arange(W2)[None, None, :] ==
           (2 * jnp.arange(W)[:, None, None] + jnp.arange(2)[None, :, None]))
    sel = sel.astype(jnp.float32)                                     # (w, kw, q)
    wup = jnp.einsum('wkq,cohk->hwcqo', sel, params["up_w"].astype(jnp.float32))
    wup = wup.reshape(2, W * Cin, WCo)
    wup_both = jnp.concatenate([wup[0], wup[1]], axis=1).astype(mm_dt)  # (W*Cin, 2*WCo)

    # Conv weights as width-Toeplitz operands; conv1's K dim is ordered
    # [up lanes (W2*Cout) | skip lanes (W2*Cs)] to match the combined scratch image.
    wt1_up = _width_toeplitz(params["c1_w"][:, :, :Cout, :], W2, mm_dt)
    wt1_sk = _width_toeplitz(params["c1_w"][:, :, Cout:, :], W2, mm_dt)
    wt1 = jnp.concatenate([wt1_up, wt1_sk], axis=1)                   # (3, W2*(Cout+Cs), WCo)
    wt2 = _width_toeplitz(params["c2_w"], W2, mm_dt)                  # (3, WCo, WCo)

    # Per-lane bias rows (lane = wo*Cout + co); epilogues stay f32.
    upb = jnp.tile(params["up_b"], W2).reshape(1, WCo).astype(jnp.float32)
    c1b = jnp.tile(params["c1_b"], W2).reshape(1, WCo).astype(jnp.float32)
    c2b = jnp.tile(params["c2_b"], W2).reshape(1, WCo).astype(jnp.float32)

    # Lane-merged inputs; x rows duplicated so the deconv matmul emits 2H rows directly.
    x_rep = jnp.repeat(x.reshape(N, H, W * Cin), 2, axis=1).astype(mm_dt)   # (N, H2, W*Cin)
    skip_flat = skip.reshape(N, H2, W2 * Cs).astype(mm_dt)                  # (N, H2, W2*Cs)

    Hp = H2 + 2
    L1 = W2 * (Cout + Cs)

    out = pl.pallas_call(
        _decoder_block_kernel,
        out_shape=jax.ShapeDtypeStruct((N, H2, WCo), jnp.float32),
        grid=(N,),
        in_specs=[
            pl.BlockSpec((1, H2, W * Cin), lambda n: (n, 0, 0)),
            pl.BlockSpec((1, H2, W2 * Cs), lambda n: (n, 0, 0)),
            pl.BlockSpec((W * Cin, 2 * WCo), lambda n: (0, 0)),
            pl.BlockSpec((1, WCo), lambda n: (0, 0)),
            pl.BlockSpec((3, L1, WCo), lambda n: (0, 0, 0)),
            pl.BlockSpec((1, WCo), lambda n: (0, 0)),
            pl.BlockSpec((3, WCo, WCo), lambda n: (0, 0, 0)),
            pl.BlockSpec((1, WCo), lambda n: (0, 0)),
        ],
        out_specs=pl.BlockSpec((1, H2, WCo), lambda n: (n, 0, 0)),
        scratch_shapes=[
            pltpu.VMEM((Hp, L1), mm_dt),    # padded combined [up | skip] image (bf16)
            pltpu.VMEM((Hp, WCo), mm_dt),   # padded conv1 output (bf16)
        ],
        compiler_params=pltpu.CompilerParams(
            # Batch elements are independent; v7x's 2 TensorCores each take a slice of N.
            dimension_semantics=("parallel",),
        ),
    )(x_rep, skip_flat, wup_both, upb, wt1, c1b, wt2, c2b)

    return out.reshape(N, H2, W2, Cout)


@jax.jit
def decoder_block(x_nchw, skip_nchw, params):
    """Matches DecoderBlock.forward (NCHW in/out, like the PyTorch module)."""
    x = jnp.transpose(x_nchw, (0, 2, 3, 1))
    skip = jnp.transpose(skip_nchw, (0, 2, 3, 1))
    z = decoder_block_nhwc(x, skip, params)
    return jnp.transpose(z, (0, 3, 1, 2))


# --------------------------- params & reference ----------------------------- #

def init_params(key, in_ch, skip_ch, out_ch):
    ks = jax.random.split(key, 6)

    def u(k, shape, fan_in):
        bound = 1.0 / (fan_in ** 0.5)
        return jax.random.uniform(k, shape, jnp.float32, -bound, bound)

    return {
        # ConvTranspose2d weight: (in_channels, out_channels, 2, 2)
        "up_w": u(ks[0], (in_ch, out_ch, 2, 2), in_ch * 4),
        "up_b": u(ks[1], (out_ch,), in_ch * 4),
        # Conv2d weights stored HWIO: (3, 3, Cin, Cout)
        "c1_w": u(ks[2], (3, 3, out_ch + skip_ch, out_ch), (out_ch + skip_ch) * 9),
        "c1_b": u(ks[3], (out_ch,), (out_ch + skip_ch) * 9),
        "c2_w": u(ks[4], (3, 3, out_ch, out_ch), out_ch * 9),
        "c2_b": u(ks[5], (out_ch,), out_ch * 9),
    }


def ref_decoder_block(x_nchw, skip_nchw, params):
    """Pure-JAX f32 reference (no Pallas) for correctness checking."""
    x = jnp.transpose(x_nchw, (0, 2, 3, 1))
    skip = jnp.transpose(skip_nchw, (0, 2, 3, 1))
    N, H, W, _ = x.shape
    cout = params["up_b"].shape[0]
    t = jnp.einsum("nhwc,cokl->nhkwlo", x, params["up_w"])
    y = t.reshape(N, 2 * H, 2 * W, cout) + params["up_b"]
    z = jnp.concatenate([y, skip], axis=-1)

    def conv(zz, w, b):
        dn = jax.lax.conv_dimension_numbers(zz.shape, w.shape, ("NHWC", "HWIO", "NHWC"))
        return jax.nn.relu(
            jax.lax.conv_general_dilated(zz, w, (1, 1), "SAME", dimension_numbers=dn) + b)

    z = conv(z, params["c1_w"], params["c1_b"])
    z = conv(z, params["c2_w"], params["c2_b"])
    return jnp.transpose(z, (0, 3, 1, 2))


# ----------------------------------- main ----------------------------------- #

if __name__ == "__main__":
    key = jax.random.PRNGKey(0)
    kx, ks, kp = jax.random.split(key, 3)

    in_ch, skip_ch, out_ch = 4, 6, 8
    N, H, W = 2, 8, 8                            # x spatial; skip is 2x larger

    x = jax.random.normal(kx, (N, in_ch, H, W), jnp.float32)              # NCHW
    skip = jax.random.normal(ks, (N, skip_ch, 2 * H, 2 * W), jnp.float32)
    params = init_params(kp, in_ch, skip_ch, out_ch)

    out = decoder_block(x, skip, params)
    jax.block_until_ready(out)

    ref = ref_decoder_block(x, skip, params)
    assert out.shape == (N, out_ch, 2 * H, 2 * W), out.shape
    # bf16 MXU operands vs. f32 reference -> loosened tolerance (expected err ~3e-3).
    err = float(jnp.abs(out - ref).max())
    assert jnp.allclose(out, ref, atol=3e-2, rtol=3e-2), err

    print("KERNEL_OK")
</pallas_src>

<mosaic_0001>
module attributes {stable_mosaic.version = 11 : i64} {
  func.func @_decoder_block_kernel(%arg0: i32, %arg1: memref<1x16x32xbf16, #tpu.memory_space<vmem>>, %arg2: memref<1x16x96xbf16, #tpu.memory_space<vmem>>, %arg3: memref<32x256xbf16, #tpu.memory_space<vmem>>, %arg4: memref<1x128xf32, #tpu.memory_space<vmem>>, %arg5: memref<3x224x128xbf16, #tpu.memory_space<vmem>>, %arg6: memref<1x128xf32, #tpu.memory_space<vmem>>, %arg7: memref<3x128x128xbf16, #tpu.memory_space<vmem>>, %arg8: memref<1x128xf32, #tpu.memory_space<vmem>>, %arg9: memref<1x16x128xf32, #tpu.memory_space<vmem>>, %arg10: memref<18x224xbf16, #tpu.memory_space<vmem>>, %arg11: memref<18x128xbf16, #tpu.memory_space<vmem>>) attributes {dimension_semantics = [#tpu.dimension_semantics<parallel>], iteration_bounds = array<i64: 2>, scalar_prefetch = 0 : i64, scratch_operands = 2 : i64, tpu.core_type = #tpu.core_type<tc>, window_params = [{transform_indices = @transform_0, window_bounds = array<i64: 1, 16, 32>}, {transform_indices = @transform_1, window_bounds = array<i64: 1, 16, 96>}, {pipeline_mode = #tpu.pipeline_mode<synchronous>, transform_indices = @transform_2, window_bounds = array<i64: 32, 256>}, {pipeline_mode = #tpu.pipeline_mode<synchronous>, transform_indices = @transform_3, window_bounds = array<i64: 1, 128>}, {pipeline_mode = #tpu.pipeline_mode<synchronous>, transform_indices = @transform_4, window_bounds = array<i64: 3, 224, 128>}, {pipeline_mode = #tpu.pipeline_mode<synchronous>, transform_indices = @transform_5, window_bounds = array<i64: 1, 128>}, {pipeline_mode = #tpu.pipeline_mode<synchronous>, transform_indices = @transform_6, window_bounds = array<i64: 3, 128, 128>}, {pipeline_mode = #tpu.pipeline_mode<synchronous>, transform_indices = @transform_7, window_bounds = array<i64: 1, 128>}, {transform_indices = @transform_8, window_bounds = array<i64: 1, 16, 128>}]} {
    %cst = arith.constant 0.000000e+00 : bf16
    %0 = vector.broadcast %cst : bf16 to vector<1x224xbf16>
    %c0 = arith.constant 0 : index
    %c0_0 = arith.constant 0 : index
    %1 = vector.load %arg10[%c0, %c0_0] : memref<18x224xbf16, #tpu.memory_space<vmem>>, vector<1x224xbf16>
    tpu.vector_store %arg10[%c0, %c0_0], %0 {strides = array<i32>} : memref<18x224xbf16, #tpu.memory_space<vmem>>, vector<1x224xbf16>,
    %cst_1 = arith.constant 0.000000e+00 : bf16
    %2 = vector.broadcast %cst_1 : bf16 to vector<1x224xbf16>
    %c17 = arith.constant 17 : index
    %c0_2 = arith.constant 0 : index
    %3 = vector.load %arg10[%c17, %c0_2] : memref<18x224xbf16, #tpu.memory_space<vmem>>, vector<1x224xbf16>
    tpu.vector_store %arg10[%c17, %c0_2], %2 {strides = array<i32>} : memref<18x224xbf16, #tpu.memory_space<vmem>>, vector<1x224xbf16>,
    %cst_3 = arith.constant 0.000000e+00 : bf16
    %4 = vector.broadcast %cst_3 : bf16 to vector<1x128xbf16>
    %c0_4 = arith.constant 0 : index
    %c0_5 = arith.constant 0 : index
    %5 = vector.load %arg11[%c0_4, %c0_5] : memref<18x128xbf16, #tpu.memory_space<vmem>>, vector<1x128xbf16>
    tpu.vector_store %arg11[%c0_4, %c0_5], %4 {strides = array<i32>} : memref<18x128xbf16, #tpu.memory_space<vmem>>, vector<1x128xbf16>,
    %cst_6 = arith.constant 0.000000e+00 : bf16
    %6 = vector.broadcast %cst_6 : bf16 to vector<1x128xbf16>
    %c17_7 = arith.constant 17 : index
    %c0_8 = arith.constant 0 : index
    %7 = vector.load %arg11[%c17_7, %c0_8] : memref<18x128xbf16, #tpu.memory_space<vmem>>, vector<1x128xbf16>
    tpu.vector_store %arg11[%c17_7, %c0_8], %6 {strides = array<i32>} : memref<18x128xbf16, #tpu.memory_space<vmem>>, vector<1x128xbf16>,
    %c0_9 = arith.constant 0 : index
    %c0_10 = arith.constant 0 : index
    %c0_11 = arith.constant 0 : index
    %8 = vector.load %arg1[%c0_9, %c0_10, %c0_11] : memref<1x16x32xbf16, #tpu.memory_space<vmem>>, vector<1x16x32xbf16>
    %9 = vector.shape_cast %8 : vector<1x16x32xbf16> to vector<16x32xbf16>
    %c0_12 = arith.constant 0 : index
    %c0_13 = arith.constant 0 : index
    %10 = vector.load %arg3[%c0_12, %c0_13] : memref<32x256xbf16, #tpu.memory_space<vmem>>, vector<32x256xbf16>
    %cst_14 = arith.constant dense<0.000000e+00> : vector<16x256xf32>
    %11 = tpu.matmul %9, %10, %cst_14 {dimension_numbers = #tpu.dot_dimension_numbers<[1], [0], [0], [1], [0, 0, 1, 1], [], []>} : vector<16x32xbf16>, vector<32x256xbf16>, vector<16x256xf32> -> vector<16x256xf32>
    %12 = tpu.iota {dimensions = array<i32: 0>} : vector<16x1xi32>
    %c2_i32 = arith.constant 2 : i32
    %c0_i32 = arith.constant 0 : i32
    %13 = arith.cmpi eq, %c2_i32, %c0_i32 : i32
    %c1_i32 = arith.constant 1 : i32
    %14 = arith.select %13, %c1_i32, %c2_i32 : i32
    %15 = vector.broadcast %14 : i32 to vector<16x1xi32>
    %16 = arith.remsi %12, %15 : vector<16x1xi32>
    %c0_i32_15 = arith.constant 0 : i32
    %17 = vector.broadcast %c0_i32_15 : i32 to vector<16x1xi32>
    %18 = arith.cmpi ne, %16, %17 : vector<16x1xi32>
    %c0_i32_16 = arith.constant 0 : i32
    %19 = vector.broadcast %c0_i32_16 : i32 to vector<16x1xi32>
    %20 = arith.cmpi slt, %16, %19 : vector<16x1xi32>
    %c0_i32_17 = arith.constant 0 : i32
    %21 = arith.cmpi slt, %14, %c0_i32_17 : i32
    %22 = vector.broadcast %21 : i1 to vector<16x1xi1>
    %23 = vector.broadcast %22 : vector<16x1xi1> to vector<16x1xi1>
    %24 = arith.xori %20, %23 : vector<16x1xi1>
    %25 = arith.andi %24, %18 : vector<16x1xi1>
    %26 = vector.broadcast %14 : i32 to vector<16x1xi32>
    %27 = arith.addi %16, %26 : vector<16x1xi32>
    %28 = arith.select %25, %27, %16 : vector<16x1xi1>, vector<16x1xi32>
    %c0_i32_18 = arith.constant 0 : i32
    %29 = vector.broadcast %c0_i32_18 : i32 to vector<16x1xi32>
    %30 = arith.cmpi eq, %28, %29 : vector<16x1xi32>
    %31 = vector.extract_strided_slice %11 {offsets = [0, 0], sizes = [16, 128], strides = [1, 1]} : vector<16x256xf32> to vector<16x128xf32>
    %32 = vector.extract_strided_slice %11 {offsets = [0, 128], sizes = [16, 128], strides = [1, 1]} : vector<16x256xf32> to vector<16x128xf32>
    %33 = vector.shape_cast %30 : vector<16x1xi1> to vector<16x1xi1>
    %34 = vector.broadcast %33 : vector<16x1xi1> to vector<16x128xi1>
    %35 = arith.select %34, %31, %32 : vector<16x128xi1>, vector<16x128xf32>
    %c0_19 = arith.constant 0 : index
    %c0_20 = arith.constant 0 : index
    %36 = vector.load %arg4[%c0_19, %c0_20] : memref<1x128xf32, #tpu.memory_space<vmem>>, vector<1x128xf32>
    %37 = vector.broadcast %36 : vector<1x128xf32> to vector<16x128xf32>
    %38 = arith.addf %35, %37 : vector<16x128xf32>
    %39 = arith.truncf %38 : vector<16x128xf32> to vector<16x128xbf16>
    %c1 = arith.constant 1 : index
    %c0_21 = arith.constant 0 : index
    %40 = vector.load %arg10[%c1, %c0_21] : memref<18x224xbf16, #tpu.memory_space<vmem>>, vector<16x128xbf16>
    tpu.vector_store %arg10[%c1, %c0_21], %39 {strides = array<i32>} : memref<18x224xbf16, #tpu.memory_space<vmem>>, vector<16x128xbf16>,
    %c0_22 = arith.constant 0 : index
    %c0_23 = arith.constant 0 : index
    %c0_24 = arith.constant 0 : index
    %41 = vector.load %arg2[%c0_22, %c0_23, %c0_24] : memref<1x16x96xbf16, #tpu.memory_space<vmem>>, vector<1x16x96xbf16>
    %42 = vector.shape_cast %41 : vector<1x16x96xbf16> to vector<16x96xbf16>
    %c1_25 = arith.constant 1 : index
    %c128 = arith.constant 128 : index
    %43 = vector.load %arg10[%c1_25, %c128] : memref<18x224xbf16, #tpu.memory_space<vmem>>, vector<16x96xbf16>
    tpu.vector_store %arg10[%c1_25, %c128], %42 {strides = array<i32>} : memref<18x224xbf16, #tpu.memory_space<vmem>>, vector<16x96xbf16>,
    %cst_26 = arith.constant 0.000000e+00 : f32
    %44 = vector.broadcast %cst_26 : f32 to vector<16x128xf32>
    %c0_27 = arith.constant 0 : index
    %c0_28 = arith.constant 0 : index
    %45 = vector.load %arg10[%c0_27, %c0_28] : memref<18x224xbf16, #tpu.memory_space<vmem>>, vector<16x224xbf16>
    %c0_29 = arith.constant 0 : index
    %c0_30 = arith.constant 0 : index
    %c0_31 = arith.constant 0 : index
    %46 = vector.load %arg5[%c0_29, %c0_30, %c0_31] : memref<3x224x128xbf16, #tpu.memory_space<vmem>>, vector<1x224x128xbf16>
    %47 = vector.shape_cast %46 : vector<1x224x128xbf16> to vector<224x128xbf16>
    %cst_32 = arith.constant dense<0.000000e+00> : vector<16x128xf32>
    %48 = tpu.matmul %45, %47, %cst_32 {dimension_numbers = #tpu.dot_dimension_numbers<[1], [0], [0], [1], [0, 0, 1, 1], [], []>} : vector<16x224xbf16>, vector<224x128xbf16>, vector<16x128xf32> -> vector<16x128xf32>
    %49 = arith.addf %44, %48 : vector<16x128xf32>
    %c1_33 = arith.constant 1 : index
    %c0_34 = arith.constant 0 : index
    %50 = vector.load %arg10[%c1_33, %c0_34] : memref<18x224xbf16, #tpu.memory_space<vmem>>, vector<16x224xbf16>
    %c1_35 = arith.constant 1 : index
    %c0_36 = arith.constant 0 : index
    %c0_37 = arith.constant 0 : index
    %51 = vector.load %arg5[%c1_35, %c0_36, %c0_37] : memref<3x224x128xbf16, #tpu.memory_space<vmem>>, vector<1x224x128xbf16>
    %52 = vector.shape_cast %51 : vector<1x224x128xbf16> to vector<224x128xbf16>
    %cst_38 = arith.constant dense<0.000000e+00> : vector<16x128xf32>
    %53 = tpu.matmul %50, %52, %cst_38 {dimension_numbers = #tpu.dot_dimension_numbers<[1], [0], [0], [1], [0, 0, 1, 1], [], []>} : vector<16x224xbf16>, vector<224x128xbf16>, vector<16x128xf32> -> vector<16x128xf32>
    %54 = arith.addf %49, %53 : vector<16x128xf32>
    %c2 = arith.constant 2 : index
    %c0_39 = arith.constant 0 : index
    %55 = vector.load %arg10[%c2, %c0_39] : memref<18x224xbf16, #tpu.memory_space<vmem>>, vector<16x224xbf16>
    %c2_40 = arith.constant 2 : index
    %c0_41 = arith.constant 0 : index
    %c0_42 = arith.constant 0 : index
    %56 = vector.load %arg5[%c2_40, %c0_41, %c0_42] : memref<3x224x128xbf16, #tpu.memory_space<vmem>>, vector<1x224x128xbf16>
    %57 = vector.shape_cast %56 : vector<1x224x128xbf16> to vector<224x128xbf16>
    %cst_43 = arith.constant dense<0.000000e+00> : vector<16x128xf32>
    %58 = tpu.matmul %55, %57, %cst_43 {dimension_numbers = #tpu.dot_dimension_numbers<[1], [0], [0], [1], [0, 0, 1, 1], [], []>} : vector<16x224xbf16>, vector<224x128xbf16>, vector<16x128xf32> -> vector<16x128xf32>
    %59 = arith.addf %54, %58 : vector<16x128xf32>
    %c0_44 = arith.constant 0 : index
    %c0_45 = arith.constant 0 : index
    %60 = vector.load %arg6[%c0_44, %c0_45] : memref<1x128xf32, #tpu.memory_space<vmem>>, vector<1x128xf32>
    %61 = vector.broadcast %60 : vector<1x128xf32> to vector<16x128xf32>
    %62 = arith.addf %59, %61 : vector<16x128xf32>
    %cst_46 = arith.constant 0.000000e+00 : f32
    %63 = vector.broadcast %cst_46 : f32 to vector<16x128xf32>
    %64 = arith.maximumf %62, %63 : vector<16x128xf32>
    %65 = arith.truncf %64 : vector<16x128xf32> to vector<16x128xbf16>
    %c1_47 = arith.constant 1 : index
    %c0_48 = arith.constant 0 : index
    %66 = vector.load %arg11[%c1_47, %c0_48] : memref<18x128xbf16, #tpu.memory_space<vmem>>, vector<16x128xbf16>
    tpu.vector_store %arg11[%c1_47, %c0_48], %65 {strides = array<i32>} : memref<18x128xbf16, #tpu.memory_space<vmem>>, vector<16x128xbf16>,
    %cst_49 = arith.constant 0.000000e+00 : f32
    %67 = vector.broadcast %cst_49 : f32 to vector<16x128xf32>
    %c0_50 = arith.constant 0 : index
    %c0_51 = arith.constant 0 : index
    %68 = vector.load %arg11[%c0_50, %c0_51] : memref<18x128xbf16, #tpu.memory_space<vmem>>, vector<16x128xbf16>
    %c0_52 = arith.constant 0 : index
    %c0_53 = arith.constant 0 : index
    %c0_54 = arith.constant 0 : index
    %69 = vector.load %arg7[%c0_52, %c0_53, %c0_54] : memref<3x128x128xbf16, #tpu.memory_space<vmem>>, vector<1x128x128xbf16>
    %70 = vector.shape_cast %69 : vector<1x128x128xbf16> to vector<128x128xbf16>
    %cst_55 = arith.constant dense<0.000000e+00> : vector<16x128xf32>
    %71 = tpu.matmul %68, %70, %cst_55 {dimension_numbers = #tpu.dot_dimension_numbers<[1], [0], [0], [1], [0, 0, 1, 1], [], []>} : vector<16x128xbf16>, vector<128x128xbf16>, vector<16x128xf32> -> vector<16x128xf32>
    %72 = arith.addf %67, %71 : vector<16x128xf32>
    %c1_56 = arith.constant 1 : index
    %c0_57 = arith.constant 0 : index
    %73 = vector.load %arg11[%c1_56, %c0_57] : memref<18x128xbf16, #tpu.memory_space<vmem>>, vector<16x128xbf16>
    %c1_58 = arith.constant 1 : index
    %c0_59 = arith.constant 0 : index
    %c0_60 = arith.constant 0 : index
    %74 = vector.load %arg7[%c1_58, %c0_59, %c0_60] : memref<3x128x128xbf16, #tpu.memory_space<vmem>>, vector<1x128x128xbf16>
    %75 = vector.shape_cast %74 : vector<1x128x128xbf16> to vector<128x128xbf16>
    %cst_61 = arith.constant dense<0.000000e+00> : vector<16x128xf32>
    %76 = tpu.matmul %73, %75, %cst_61 {dimension_numbers = #tpu.dot_dimension_numbers<[1], [0], [0], [1], [0, 0, 1, 1], [], []>} : vector<16x128xbf16>, vector<128x128xbf16>, vector<16x128xf32> -> vector<16x128xf32>
    %77 = arith.addf %72, %76 : vector<16x128xf32>
    %c2_62 = arith.constant 2 : index
    %c0_63 = arith.constant 0 : index
    %78 = vector.load %arg11[%c2_62, %c0_63] : memref<18x128xbf16, #tpu.memory_space<vmem>>, vector<16x128xbf16>
    %c2_64 = arith.constant 2 : index
    %c0_65 = arith.constant 0 : index
    %c0_66 = arith.constant 0 : index
    %79 = vector.load %arg7[%c2_64, %c0_65, %c0_66] : memref<3x128x128xbf16, #tpu.memory_space<vmem>>, vector<1x128x128xbf16>
    %80 = vector.shape_cast %79 : vector<1x128x128xbf16> to vector<128x128xbf16>
    %cst_67 = arith.constant dense<0.000000e+00> : vector<16x128xf32>
    %81 = tpu.matmul %78, %80, %cst_67 {dimension_numbers = #tpu.dot_dimension_numbers<[1], [0], [0], [1], [0, 0, 1, 1], [], []>} : vector<16x128xbf16>, vector<128x128xbf16>, vector<16x128xf32> -> vector<16x128xf32>
    %82 = arith.addf %77, %81 : vector<16x128xf32>
    %c0_68 = arith.constant 0 : index
    %c0_69 = arith.constant 0 : index
    %83 = vector.load %arg8[%c0_68, %c0_69] : memref<1x128xf32, #tpu.memory_space<vmem>>, vector<1x128xf32>
    %84 = vector.broadcast %83 : vector<1x128xf32> to vector<16x128xf32>
    %85 = arith.addf %82, %84 : vector<16x128xf32>
    %cst_70 = arith.constant 0.000000e+00 : f32
    %86 = vector.broadcast %cst_70 : f32 to vector<16x128xf32>
    %87 = arith.maximumf %85, %86 : vector<16x128xf32>
    %c0_71 = arith.constant 0 : index
    %c0_72 = arith.constant 0 : index
    %c0_73 = arith.constant 0 : index
    %88 = vector.load %arg9[%c0_71, %c0_72, %c0_73] : memref<1x16x128xf32, #tpu.memory_space<vmem>>, vector<1x16x128xf32>
    %89 = vector.shape_cast %88 : vector<1x16x128xf32> to vector<16x128xf32>
    %90 = vector.shape_cast %87 : vector<16x128xf32> to vector<1x16x128xf32>
    tpu.vector_store %arg9[%c0_71, %c0_72, %c0_73], %90 {strides = array<i32>} : memref<1x16x128xf32, #tpu.memory_space<vmem>>, vector<1x16x128xf32>,
    return
  }
  func.func @transform_0(%arg0: i32) -> (i32, i32, i32) {
    %c0_i32 = arith.constant 0 : i32
    %c0_i32_0 = arith.constant 0 : i32
    %c0_i32_1 = arith.constant 0 : i32
    return %arg0, %c0_i32, %c0_i32_0 : i32, i32, i32
  }
  func.func @transform_1(%arg0: i32) -> (i32, i32, i32) {
    %c0_i32 = arith.constant 0 : i32
    %c0_i32_0 = arith.constant 0 : i32
    %c0_i32_1 = arith.constant 0 : i32
    return %arg0, %c0_i32, %c0_i32_0 : i32, i32, i32
  }
  func.func @transform_2(%arg0: i32) -> (i32, i32) {
    %c0_i32 = arith.constant 0 : i32
    %c0_i32_0 = arith.constant 0 : i32
    %c0_i32_1 = arith.constant 0 : i32
    return %c0_i32, %c0_i32_0 : i32, i32
  }
  func.func @transform_3(%arg0: i32) -> (i32, i32) {
    %c0_i32 = arith.constant 0 : i32
    %c0_i32_0 = arith.constant 0 : i32
    %c0_i32_1 = arith.constant 0 : i32
    return %c0_i32, %c0_i32_0 : i32, i32
  }
  func.func @transform_4(%arg0: i32) -> (i32, i32, i32) {
    %c0_i32 = arith.constant 0 : i32
    %c0_i32_0 = arith.constant 0 : i32
    %c0_i32_1 = arith.constant 0 : i32
    %c0_i32_2 = arith.constant 0 : i32
    return %c0_i32, %c0_i32_0, %c0_i32_1 : i32, i32, i32
  }
  func.func @transform_5(%arg0: i32) -> (i32, i32) {
    %c0_i32 = arith.constant 0 : i32
    %c0_i32_0 = arith.constant 0 : i32
    %c0_i32_1 = arith.constant 0 : i32
    return %c0_i32, %c0_i32_0 : i32, i32
  }
  func.func @transform_6(%arg0: i32) -> (i32, i32, i32) {
    %c0_i32 = arith.constant 0 : i32
    %c0_i32_0 = arith.constant 0 : i32
    %c0_i32_1 = arith.constant 0 : i32
    %c0_i32_2 = arith.constant 0 : i32
    return %c0_i32, %c0_i32_0, %c0_i32_1 : i32, i32, i32
  }
  func.func @transform_7(%arg0: i32) -> (i32, i32) {
    %c0_i32 = arith.constant 0 : i32
    %c0_i32_0 = arith.constant 0 : i32
    %c0_i32_1 = arith.constant 0 : i32
    return %c0_i32, %c0_i32_0 : i32, i32
  }
  func.func @transform_8(%arg0: i32) -> (i32, i32, i32) {
    %c0_i32 = arith.constant 0 : i32
    %c0_i32_0 = arith.constant 0 : i32
    %c0_i32_1 = arith.constant 0 : i32
    return %arg0, %c0_i32, %c0_i32_0 : i32, i32, i32
  }
}

</mosaic_0001>

<bundles_post_ra>
// kernel: squeeze.1
= control target key start
LH: loop header
LB: loop body
LE: loop exit
PB: predicated region body
PF: predicated region fallthrough
CT: control target
= control target key end

     0   :  { %s3008_s18 = smov 3  ;;  %s3010_s19 = smov 12  ;;  %vm1029_vm0 = vcmask 1043458   ;;  %vm1033_vm1 = vcmask 1045508   ;;  %vm1037_vm2 = vcmask 1047558   ;;  %vm1039_vm3 = vcmask 64512   ;;  %s3463_s0 = inlined_call_operand.vmem [shape: bf16[1,8,4,16,8], index: 0, kind: input, shape index: {}]   ;;  %s3464_s1 = inlined_call_operand.vmem [shape: bf16[32,128], index: 1, kind: output, shape index: {}]  }
   0x1   :  { %v2990_v0 = vld [vmem:[%s3463_s0 + $0x78] sm:$0xff]   ;;  %v2782_v1 = vld [vmem:[%s3463_s0 + $0x70] sm:$0xff]   ;;  %v2783_v2 = vld [vmem:[%s3463_s0 + $0x68] sm:$0xff]   ;;  %s3023_s26 = smov 48  ;;  %s3025_s27 = smov 192  ;;  %vm1124_vm4 = vcmask 1048512  }
   0x2   :  { %v2694_v3 = vunpack.c.h.bf16 %v2990_v0  ;;  %v2697_v4 = vunpack.c.l.bf16 %v2782_v1  ;;  %v2698_v5 = vunpack.c.h.bf16 %v2782_v1  ;;  %v2701_v6 = vunpack.c.l.bf16 %v2783_v2  ;;  %v2784_v7 = vld [vmem:[%s3463_s0 + $0x60] sm:$0xff]   ;;  %v2785_v8 = vld [vmem:[%s3463_s0 + $0x58] sm:$0xff]   ;;  %v2786_v9 = vld [vmem:[%s3463_s0 + $0x50] sm:$0xff]   ;;  %s3042_s5 = smov 3  ;;  %s3060_s12 = smov 12 }
   0x3   :  { %v2702_v10 = vunpack.c.h.bf16 %v2783_v2  ;;  %v2705_v11 = vunpack.c.l.bf16 %v2784_v7  ;;  %v2706_v12 = vunpack.c.h.bf16 %v2784_v7  ;;  %v2709_v13 = vunpack.c.l.bf16 %v2785_v8  ;;  %v2787_v14 = vld [vmem:[%s3463_s0 + $0x48] sm:$0xff]   ;;  %v2788_v15 = vld [vmem:[%s3463_s0 + $0x40] sm:$0xff]   ;;  %v3021_v16 = vld [vmem:[%s3463_s0 + $0x38] sm:$0xff]   ;;  %s3062_s13 = smov 48  ;;  %s3071_s16 = smov 192 }
   0x4   :  { %532 = vst [vmem:[#allocation1 + $0xf8] sm:$0xff] %v2694_v3  ;;  %564 = vst [vmem:[#allocation1 + $0xe8] sm:$0xff] %v2698_v5  ;;  %v2710_v17 = vunpack.c.h.bf16 %v2785_v8  ;;  %v2713_v18 = vunpack.c.l.bf16 %v2786_v9  ;;  %v2714_v19 = vunpack.c.h.bf16 %v2786_v9  ;;  %v2717_v20 = vunpack.c.l.bf16 %v2787_v14  ;;  %v3030_v21 = vld [vmem:[%s3463_s0 + $0x30] sm:$0xff]   ;;  %v3035_v22 = vld [vmem:[%s3463_s0 + $0x28] sm:$0xff]   ;;  %s3073_s17 = smov 3  ;;  %s3088_s24 = smov 12 }
   0x5   :  { %v3040_v23 = vld [vmem:[%s3463_s0 + $0x20] sm:$0xff]   ;;  %580 = vst [vmem:[#allocation1 + $0xe0] sm:$0xff] %v2697_v4  ;;  %612 = vst [vmem:[#allocation1 + $0xd0] sm:$0xff] %v2701_v6  ;;  %v2718_v24 = vunpack.c.h.bf16 %v2787_v14  ;;  %v2721_v25 = vunpack.c.l.bf16 %v2788_v15  ;;  %v2722_v26 = vunpack.c.h.bf16 %v2788_v15  ;;  %v2726_v27 = vunpack.c.h.bf16 %v3021_v16  ;;  %v3048_v28 = vld [vmem:[%s3463_s0 + $0x18] sm:$0xff]   ;;  %s3090_s25 = smov 48  ;;  %s3111_s6 = smov 192 }
   0x6   :  { %596 = vst [vmem:[#allocation1 + $0xd8] sm:$0xff] %v2702_v10  ;;  %628 = vst [vmem:[#allocation1 + $0xc8] sm:$0xff] %v2706_v12  ;;  %v3053_v29 = vld [vmem:[%s3463_s0 + $0x10] sm:$0xff]   ;;  %v3058_v30 = vld [vmem:[%s3463_s0 + $0x8] sm:$0xff]   ;;  %v2730_v31 = vunpack.c.h.bf16 %v3030_v21  ;;  %v2734_v32 = vunpack.c.h.bf16 %v3035_v22  ;;  %v2738_v33 = vunpack.c.h.bf16 %v3040_v23  ;;  %v2742_v34 = vunpack.c.h.bf16 %v3048_v28  ;;  %s3131_s15 = smov 3  ;;  %s3133_s20 = smov 12 }
   0x7   :  { %644 = vst [vmem:[#allocation1 + $0xc0] sm:$0xff] %v2705_v11  ;;  %676 = vst [vmem:[#allocation1 + $0xb0] sm:$0xff] %v2709_v13  ;;  %v2752_v35 = vld [vmem:[%s3463_s0] sm:$0xff]   ;;  %v3078_v36 = vld [vmem:[%s3463_s0 + $0xf8] sm:$0xff]   ;;  %v2746_v38 = vunpack.c.h.bf16 %v3053_v29  ;;  %v2750_v39 = vunpack.c.h.bf16 %v3058_v30  ;;  %v2693_v41 = vunpack.c.l.bf16 %v2990_v0  ;;  %v2725_v45 = vunpack.c.l.bf16 %v3021_v16  ;;  %s3150_s2 = smov 48  ;;  %s3152_s3 = smov 192 }
   0x8   :  { %660 = vst [vmem:[#allocation1 + $0xb8] sm:$0xff] %v2710_v17  ;;  %692 = vst [vmem:[#allocation1 + $0xa8] sm:$0xff] %v2714_v19  ;;  %v3083_v37 = vld [vmem:[%s3463_s0 + $0xf0] sm:$0xff]   ;;  %v2754_v40 = vunpack.c.h.bf16 %v2752_v35  ;;  %v3095_v42 = vld [vmem:[%s3463_s0 + $0xe8] sm:$0xff]   ;;  %v2729_v46 = vunpack.c.l.bf16 %v3030_v21  ;;  %v2733_v47 = vunpack.c.l.bf16 %v3035_v22  ;;  %v2737_v48 = vunpack.c.l.bf16 %v3040_v23  ;;  %s3189_s28 = smov 12  ;;  %s3195_s29 = smov 48 }
   0x9   :  { %708 = vst [vmem:[#allocation1 + $0xa0] sm:$0xff] %v2713_v18  ;;  %740 = vst [vmem:[#allocation1 + $0x90] sm:$0xff] %v2717_v20  ;;  %v3100_v43 = vld [vmem:[%s3463_s0 + $0xe0] sm:$0xff]   ;;  %v3105_v44 = vld [vmem:[%s3463_s0 + $0xd8] sm:$0xff]   ;;  %v2741_v52 = vunpack.c.l.bf16 %v3048_v28  ;;  %v2745_v53 = vunpack.c.l.bf16 %v3053_v29  ;;  %v2749_v54 = vunpack.c.l.bf16 %v3058_v30  ;;  %v2753_v55 = vunpack.c.l.bf16 %v2752_v35  ;;  %s3197_s30 = smov 192  ;;  %s3203_s4 = smov 3 }
   0xa   :  { %724 = vst [vmem:[#allocation1 + $0x98] sm:$0xff] %v2718_v24  ;;  %756 = vst [vmem:[#allocation1 + $0x88] sm:$0xff] %v2722_v26  ;;  %v3116_v49 = vld [vmem:[%s3463_s0 + $0xd0] sm:$0xff]   ;;  %v3121_v50 = vld [vmem:[%s3463_s0 + $0xc8] sm:$0xff]   ;;  %v2630_v59 = vunpack.c.h.bf16 %v3078_v36  ;;  %v2634_v60 = vunpack.c.h.bf16 %v3083_v37  ;;  %v2638_v61 = vunpack.c.h.bf16 %v3095_v42  ;;  %v2642_v62 = vunpack.c.h.bf16 %v3100_v43  ;;  %s3205_s7 = smov 12  ;;  %s1355_s8 = smov 3 }
   0xb   :  { %788 = vst [vmem:[#allocation1 + $0x78] sm:$0xff] %v2726_v27  ;;  %772 = vst [vmem:[#allocation1 + $0x80] sm:$0xff] %v2721_v25  ;;  %v3126_v51 = vld [vmem:[%s3463_s0 + $0xc0] sm:$0xff]   ;;  %v3138_v56 = vld [vmem:[%s3463_s0 + $0xb8] sm:$0xff]   ;;  %v2646_v2 = vunpack.c.h.bf16 %v3105_v44  ;;  %v2650_v3 = vunpack.c.h.bf16 %v3116_v49  ;;  %v2654_v4 = vunpack.c.h.bf16 %v3121_v50  ;;  %v2629_v19 = vunpack.c.l.bf16 %v3078_v36  ;;  %s1358_s9 = smov 12  ;;  %s1363_s10 = smov 48 }
   0xc   :  { %820 = vst [vmem:[#allocation1 + $0x68] sm:$0xff] %v2730_v31  ;;  %852 = vst [vmem:[#allocation1 + $0x58] sm:$0xff] %v2734_v32  ;;  %v3143_v57 = vld [vmem:[%s3463_s0 + $0xb0] sm:$0xff]   ;;  %v3148_v58 = vld [vmem:[%s3463_s0 + $0xa8] sm:$0xff]   ;;  %v2658_v5 = vunpack.c.h.bf16 %v3126_v51  ;;  %v2662_v8 = vunpack.c.h.bf16 %v3138_v56  ;;  %v2633_v20 = vunpack.c.l.bf16 %v3083_v37  ;;  %v2637_v21 = vunpack.c.l.bf16 %v3095_v42  ;;  %s1368_s11 = smov 192  ;;  %s1287_s14 = smov 3 }
   0xd   :  { %884 = vst [vmem:[#allocation1 + $0x48] sm:$0xff] %v2738_v33  ;;  %916 = vst [vmem:[#allocation1 + $0x38] sm:$0xff] %v2742_v34  ;;  %v3161_v63 = vld [vmem:[%s3463_s0 + $0xa0] sm:$0xff]   ;;  %v3166_v0 = vld [vmem:[%s3463_s0 + $0x98] sm:$0xff]   ;;  %v2666_v9 = vunpack.c.h.bf16 %v3143_v57  ;;  %v2670_v10 = vunpack.c.h.bf16 %v3148_v58  ;;  %v2641_v22 = vunpack.c.l.bf16 %v3100_v43  ;;  %v2645_v27 = vunpack.c.l.bf16 %v3105_v44  ;;  %s1290_s21 = smov 12  ;;  %s1295_s22 = smov 48 }
   0xe   :  { %948 = vst [vmem:[#allocation1 + $0x28] sm:$0xff] %v2746_v38  ;;  %980 = vst [vmem:[#allocation1 + $0x18] sm:$0xff] %v2750_v39  ;;  %v3171_v1 = vld [vmem:[%s3463_s0 + $0x90] sm:$0xff]   ;;  %v3180_v6 = vld [vmem:[%s3463_s0 + $0x88] sm:$0xff]   ;;  %v2674_v11 = vunpack.c.h.bf16 %v3161_v63  ;;  %v2678_v12 = vunpack.c.h.bf16 %v3166_v0  ;;  %v2649_v28 = vunpack.c.l.bf16 %v3116_v49  ;;  %v2653_v29 = vunpack.c.l.bf16 %v3121_v50  ;;  %s1300_s23 = smov 192 }
   0xf   :  { %1011 = vst [vmem:[#allocation1 + $0x8] sm:$0xff] %v2754_v40  ;;  %548 = vst [vmem:[#allocation1 + $0xf0] sm:$0xff] %v2693_v41  ;;  %v3185_v7 = vld [vmem:[%s3463_s0 + $0x80] sm:$0xff]   ;;  %s3187_s0 = smov 3  ;;  %v2682_v13 = vunpack.c.h.bf16 %v3171_v1  ;;  %v2686_v14 = vunpack.c.h.bf16 %v3180_v6  ;;  %v2657_v35 = vunpack.c.l.bf16 %v3126_v51  ;;  %v2661_v36 = vunpack.c.l.bf16 %v3138_v56 }
  0x10   :  { %804 = vst [vmem:[#allocation1 + $0x70] sm:$0xff] %v2725_v45  ;;  %836 = vst [vmem:[#allocation1 + $0x60] sm:$0xff] %v2729_v46  ;;  %v2690_v15 = vunpack.c.h.bf16 %v3185_v7  ;;  %v2665_v42 = vunpack.c.l.bf16 %v3143_v57  ;;  %v2669_v43 = vunpack.c.l.bf16 %v3148_v58  ;;  %v2673_v49 = vunpack.c.l.bf16 %v3161_v63 }
  0x11   :  { %868 = vst [vmem:[#allocation1 + $0x50] sm:$0xff] %v2733_v47  ;;  %900 = vst [vmem:[#allocation1 + $0x40] sm:$0xff] %v2737_v48  ;;  %v1219_v16 = vld [vmem:[#allocation1 + $0x8e] ss:$16 sm:%s3042_s5]   ;;  %v1128_v25 = vld [vmem:[#allocation1 + $0x8f] ss:$16 sm:%s3131_s15]   ;;  %v2677_v50 = vunpack.c.l.bf16 %v3166_v0 }
  0x12   :  { %932 = vst [vmem:[#allocation1 + $0x30] sm:$0xff] %v2741_v52  ;;  %964 = vst [vmem:[#allocation1 + $0x20] sm:$0xff] %v2745_v53  ;;  %v1222_v17 = vld [vmem:[#allocation1 + $0x8e] ss:$16 sm:%s3060_s12]   ;;  %v1131_v26 = vld [vmem:[#allocation1 + $0x8f] ss:$16 sm:%s3133_s20]  }
  0x13   :  { %996 = vst [vmem:[#allocation1 + $0x10] sm:$0xff] %v2749_v54  ;;  %1024 = vst [vmem:[#allocation1] sm:$0xff] %v2753_v55  ;;  %v1227_v18 = vld [vmem:[#allocation1 + $0x8e] ss:$16 sm:%s3062_s13]   ;;  %v1224_v23 = vsel %vm1029_vm0, %v1222_v17, %v1219_v16  ;;  %v1133_v34 = vsel %vm1029_vm0, %v1131_v26, %v1128_v25  ;;  %v1136_v48 = vld [vmem:[#allocation1 + $0x8f] ss:$16 sm:%s3150_s2]   ;;  %v2681_v55 = vunpack.c.l.bf16 %v3171_v1 }
  0x14   :  { %20 = vst [vmem:[#allocation1 + $0x1f8] sm:$0xff] %v2630_v59  ;;  %52 = vst [vmem:[#allocation1 + $0x1e8] sm:$0xff] %v2634_v60  ;;  %v1232_v24 = vld [vmem:[#allocation1 + $0x8e] ss:$16 sm:%s3071_s16]   ;;  %v1229_v33 = vsel %vm1033_vm1, %v1227_v18, %v1224_v23  ;;  %v1138_v53 = vsel %vm1033_vm1, %v1136_v48, %v1133_v34  ;;  %v1141_v54 = vld [vmem:[#allocation1 + $0x8f] ss:$16 sm:%s3152_s3]  }
  0x15   :  { %84 = vst [vmem:[#allocation1 + $0x1d8] sm:$0xff] %v2638_v61  ;;  %116 = vst [vmem:[#allocation1 + $0x1c8] sm:$0xff] %v2642_v62  ;;  %v1234_v39 = vsel %vm1037_vm2, %v1232_v24, %v1229_v33  ;;  %v1143_v58 = vsel %vm1037_vm2, %v1141_v54, %v1138_v53  ;;  %v2685_v62 = vunpack.c.l.bf16 %v3180_v6  ;;  %s2962_s5 = smov 112   ;;  %s2963_s12 = smov 120   ;;  %vm1215_vm5 = vcmask 982912  }
  0x16   :  { %148 = vst [vmem:[#allocation1 + $0x1b8] sm:$0xff] %v2646_v2  ;;  %180 = vst [vmem:[#allocation1 + $0x1a8] sm:$0xff] %v2650_v3  ;;  %v1197_v30 = vld [vmem:[#allocation1 + $0xe] ss:$16 sm:%s3008_s18]   ;;  %v1106_v40 = vld [vmem:[#allocation1 + $0xf] ss:$16 sm:%s3073_s17]   ;;  %v2689_v2 = vunpack.c.l.bf16 %v3185_v7 }
  0x17   :  { %212 = vst [vmem:[#allocation1 + $0x198] sm:$0xff] %v2654_v4  ;;  %244 = vst [vmem:[#allocation1 + $0x188] sm:$0xff] %v2658_v5  ;;  %v1200_v31 = vld [vmem:[#allocation1 + $0xe] ss:$16 sm:%s3010_s19]   ;;  %v1109_v41 = vld [vmem:[#allocation1 + $0xf] ss:$16 sm:%s3088_s24]  }
  0x18   :  { %276 = vst [vmem:[#allocation1 + $0x178] sm:$0xff] %v2662_v8  ;;  %308 = vst [vmem:[#allocation1 + $0x168] sm:$0xff] %v2666_v9  ;;  %v1205_v32 = vld [vmem:[#allocation1 + $0xe] ss:$16 sm:%s3023_s26]   ;;  %v1202_v37 = vsel %vm1029_vm0, %v1200_v31, %v1197_v30  ;;  %v1111_v45 = vsel %vm1029_vm0, %v1109_v41, %v1106_v40  ;;  %v1114_v46 = vld [vmem:[#allocation1 + $0xf] ss:$16 sm:%s3090_s25]  }
  0x19   :  { %340 = vst [vmem:[#allocation1 + $0x158] sm:$0xff] %v2670_v10  ;;  %372 = vst [vmem:[#allocation1 + $0x148] sm:$0xff] %v2674_v11  ;;  %v1210_v38 = vld [vmem:[#allocation1 + $0xe] ss:$16 sm:%s3025_s27]   ;;  %v1207_v44 = vsel %vm1033_vm1, %v1205_v32, %v1202_v37  ;;  %v1119_v47 = vld [vmem:[#allocation1 + $0xf] ss:$16 sm:%s3111_s6]   ;;  %v1116_v52 = vsel %vm1033_vm1, %v1114_v46, %v1111_v45 }
  0x1a   :  { %404 = vst [vmem:[#allocation1 + $0x138] sm:$0xff] %v2678_v12  ;;  %436 = vst [vmem:[#allocation1 + $0x128] sm:$0xff] %v2682_v13  ;;  %v1212_v51 = vsel %vm1037_vm2, %v1210_v38, %v1207_v44  ;;  %s1272_s18 = smov 48  ;;  %s1277_s19 = smov 192  ;;  %v1121_v57 = vsel %vm1037_vm2, %v1119_v47, %v1116_v52  ;;  %v1288_v40 = vld [vmem:[#allocation1 + $0xd] ss:$16 sm:%s1287_s14]  }
  0x1b   :  { %468 = vst [vmem:[#allocation1 + $0x118] sm:$0xff] %v2686_v14  ;;  %500 = vst [vmem:[#allocation1 + $0x108] sm:$0xff] %v2690_v15  ;;  %v2822_v56 = vpack.i.bf16 %v1234_v39, %v1212_v51  ;;  %v2812_v63 = vpack.i.bf16 %v1143_v58, %v1121_v57  ;;  %s1150_s26 = smov 3  ;;  %s1153_s27 = smov 12  ;;  %v1301_v46 = vld [vmem:[#allocation1 + $0xd] ss:$16 sm:%s1300_s23]  }
  0x1c   :  { %36 = vst [vmem:[#allocation1 + $0x1f0] sm:$0xff] %v2629_v19  ;;  %68 = vst [vmem:[#allocation1 + $0x1e0] sm:$0xff] %v2633_v20  ;;  %s1158_s13 = smov 48  ;;  %s1163_s16 = smov 192  ;;  %vm1306_vm6 = vcmask 917312   ;;  %vm1397_vm7 = vcmask 851712  }
  0x1d   :  { %100 = vst [vmem:[#allocation1 + $0x1d0] sm:$0xff] %v2637_v21  ;;  %132 = vst [vmem:[#allocation1 + $0x1c0] sm:$0xff] %v2641_v22  ;;  %2823 = vrot.lane.b32.xlu1 %v2822_v56, %s2962_s5  ;;  %2813 = vrot.lane.b32.xlu0 %v2812_v63, %s2963_s12  ;;  %s1173_s17 = smov 3  ;;  %s1176_s24 = smov 12  ;;  %vm1488_vm8 = vcmask 786112   ;;  %vm1579_vm9 = vcmask 720512  }
  0x1e   :  { %164 = vst [vmem:[#allocation1 + $0x1b0] sm:$0xff] %v2645_v27  ;;  %196 = vst [vmem:[#allocation1 + $0x1a0] sm:$0xff] %v2649_v28  ;;  %v1265_v59 = vld [vmem:[#allocation1 + $0x18e] ss:$16 sm:%s3203_s4]   ;;  %v1174_v19 = vld [vmem:[#allocation1 + $0x18f] ss:$16 sm:%s1173_s17]  }
  0x1f   :  { %228 = vst [vmem:[#allocation1 + $0x190] sm:$0xff] %v2653_v29  ;;  %260 = vst [vmem:[#allocation1 + $0x180] sm:$0xff] %v2657_v35  ;;  %v1268_v60 = vld [vmem:[#allocation1 + $0x18e] ss:$16 sm:%s3205_s7]   ;;  %v1177_v20 = vld [vmem:[#allocation1 + $0x18f] ss:$16 sm:%s1176_s24]  }
  0x20   :  { %292 = vst [vmem:[#allocation1 + $0x170] sm:$0xff] %v2661_v36  ;;  %324 = vst [vmem:[#allocation1 + $0x160] sm:$0xff] %v2665_v42  ;;  %v1273_v61 = vld [vmem:[#allocation1 + $0x18e] ss:$16 sm:%s1272_s18]   ;;  %v1270_v0 = vsel %vm1029_vm0, %v1268_v60, %v1265_v59  ;;  %s1181_s25 = smov 48  ;;  %s1186_s6 = smov 192  ;;  %v1179_v22 = vsel %vm1029_vm0, %v1177_v20, %v1174_v19 }
  0x21   :  { %356 = vst [vmem:[#allocation1 + $0x150] sm:$0xff] %v2669_v43  ;;  %388 = vst [vmem:[#allocation1 + $0x140] sm:$0xff] %v2673_v49  ;;  %v1278_v1 = vld [vmem:[#allocation1 + $0x18e] ss:$16 sm:%s1277_s19]   ;;  %v1275_v6 = vsel %vm1033_vm1, %v1273_v61, %v1270_v0  ;;  %v1182_v23 = vld [vmem:[#allocation1 + $0x18f] ss:$16 sm:%s1181_s25]  }
  0x22   :  { %420 = vst [vmem:[#allocation1 + $0x130] sm:$0xff] %v2677_v50  ;;  %452 = vst [vmem:[#allocation1 + $0x120] sm:$0xff] %v2681_v55  ;;  %v1242_v3 = vld [vmem:[#allocation1 + $0x10e] ss:$16 sm:%s3187_s0]   ;;  %v1280_v9 = vsel %vm1037_vm2, %v1278_v1, %v1275_v6  ;;  %v1151_v10 = vld [vmem:[#allocation1 + $0x10f] ss:$16 sm:%s1150_s26]   ;;  %v1184_v25 = vsel %vm1033_vm1, %v1182_v23, %v1179_v22 }
  0x23   :  { %v1245_v4 = vld [vmem:[#allocation1 + $0x10e] ss:$16 sm:%s3189_s28]   ;;  %484 = vst [vmem:[#allocation1 + $0x110] sm:$0xff] %v2685_v62  ;;  %v1154_v11 = vld [vmem:[#allocation1 + $0x10f] ss:$16 sm:%s1153_s27]   ;;  %516 = vst [vmem:[#allocation1 + $0x100] sm:$0xff] %v2689_v2 }
  0x24   :  { %v1250_v5 = vld [vmem:[#allocation1 + $0x10e] ss:$16 sm:%s3195_s29]   ;;  %v1247_v7 = vsel %vm1029_vm0, %v1245_v4, %v1242_v3  ;;  %v1156_v13 = vsel %vm1029_vm0, %v1154_v11, %v1151_v10  ;;  %v1159_v15 = vld [vmem:[#allocation1 + $0x10f] ss:$16 sm:%s1158_s13]   ;;  %s1332_s15 = smov 3  ;;  %s1335_s20 = smov 12 }
  0x25   :  { %v1255_v8 = vld [vmem:[#allocation1 + $0x10e] ss:$16 sm:%s3197_s30]   ;;  %v1252_v12 = vsel %vm1033_vm1, %v1250_v5, %v1247_v7  ;;  %v1164_v16 = vld [vmem:[#allocation1 + $0x10f] ss:$16 sm:%s1163_s16]   ;;  %v1161_v18 = vsel %vm1033_vm1, %v1159_v15, %v1156_v13  ;;  %v1333_v26 = vld [vmem:[#allocation1 + $0x10d] ss:$16 sm:%s1332_s15]  }
  0x26   :  { %v1257_v14 = vsel %vm1037_vm2, %v1255_v8, %v1252_v12  ;;  %v1166_v21 = vsel %vm1037_vm2, %v1164_v16, %v1161_v18  ;;  %v1187_v24 = vld [vmem:[#allocation1 + $0x18f] ss:$16 sm:%s1186_s6]   ;;  %s1340_s2 = smov 48  ;;  %v1336_v28 = vld [vmem:[#allocation1 + $0x10d] ss:$16 sm:%s1335_s20]   ;;  %s1345_s3 = smov 192 }
  0x27   :  { %v2827_v17 = vpack.i.bf16 %v1280_v9, %v1257_v14  ;;  %v1189_v27 = vsel %vm1037_vm2, %v1187_v24, %v1184_v25  ;;  %v1341_v29 = vld [vmem:[#allocation1 + $0x10d] ss:$16 sm:%s1340_s2]   ;;  %v1338_v31 = vsel %vm1029_vm0, %v1336_v28, %v1333_v26  ;;  %s1309_s0 = smov 3  ;;  %s1312_s28 = smov 12  ;;  %vm1670_vm10 = vcmask 654912  }
  0x28   :  { %v2817_v30 = vpack.i.bf16 %v1189_v27, %v1166_v21  ;;  %v1346_v32 = vld [vmem:[#allocation1 + $0x10d] ss:$16 sm:%s1345_s3]   ;;  %v1343_v34 = vsel %vm1033_vm1, %v1341_v29, %v1338_v31  ;;  %s1317_s29 = smov 48  ;;  %s1322_s30 = smov 192  ;;  %vm1761_vm11 = vcmask 589312   ;;  %vm1852_vm12 = vcmask 523712  }
  0x29   :  { %2828 = vrot.lane.b32.xlu1 %v2827_v17, %s2962_s5  ;;  %v1356_v33 = vld [vmem:[#allocation1 + $0x18d] ss:$16 sm:%s1355_s8]   ;;  %v1348_v37 = vsel %vm1037_vm2, %v1346_v32, %v1343_v34  ;;  %s1423_s4 = smov 3  ;;  %s1426_s7 = smov 12  ;;  %vm1943_vm13 = vcmask 458112   ;;  %vm2034_vm14 = vcmask 392512  }
  0x2a   :  { %v1359_v35 = vld [vmem:[#allocation1 + $0x18d] ss:$16 sm:%s1358_s9]   ;;  %2818 = vrot.lane.b32.xlu0 %v2817_v30, %s2963_s12  ;;  %s2964_s18 = smov 104   ;;  %v1424_v56 = vld [vmem:[#allocation1 + $0x10c] ss:$16 sm:%s1423_s4]   ;;  %s1431_s19 = smov 48 }
  0x2b   :  { %v1364_v36 = vld [vmem:[#allocation1 + $0x18d] ss:$16 sm:%s1363_s10]   ;;  %v1361_v38 = vsel %vm1029_vm0, %v1359_v35, %v1356_v33  ;;  %v1427_v57 = vld [vmem:[#allocation1 + $0x10c] ss:$16 sm:%s1426_s7]   ;;  %s1436_s26 = smov 192  ;;  %s1446_s27 = smov 3 }
  0x2c   :  { %v1369_v39 = vld [vmem:[#allocation1 + $0x18d] ss:$16 sm:%s1368_s11]   ;;  %v1366_v41 = vsel %vm1033_vm1, %v1364_v36, %v1361_v38  ;;  %v1429_v59 = vsel %vm1029_vm0, %v1427_v57, %v1424_v56  ;;  %v1432_v60 = vld [vmem:[#allocation1 + $0x10c] ss:$16 sm:%s1431_s19]   ;;  %s1449_s5 = smov 12  ;;  %s1454_s12 = smov 48 }
  0x2d   :  { %v1291_v42 = vld [vmem:[#allocation1 + $0xd] ss:$16 sm:%s1290_s21]   ;;  %v1371_v44 = vsel %vm1037_vm2, %v1369_v39, %v1366_v41  ;;  %v1437_v61 = vld [vmem:[#allocation1 + $0x10c] ss:$16 sm:%s1436_s26]   ;;  %v1434_v63 = vsel %vm1033_vm1, %v1432_v60, %v1429_v59  ;;  %s1459_s13 = smov 192  ;;  %s1378_s16 = smov 3 }
  0x2e   :  { %v1296_v43 = vld [vmem:[#allocation1 + $0xd] ss:$16 sm:%s1295_s22]   ;;  %v1293_v45 = vsel %vm1029_vm0, %v1291_v42, %v1288_v40  ;;  %v2837_v48 = vpack.i.bf16 %v1371_v44, %v1348_v37  ;;  %v1447_v0 = vld [vmem:[#allocation1 + $0x18c] ss:$16 sm:%s1446_s27]   ;;  %v1439_v2 = vsel %vm1037_vm2, %v1437_v61, %v1434_v63  ;;  %s1381_s17 = smov 12  ;;  %s1386_s24 = smov 48 }
  0x2f   :  { %v1310_v47 = vld [vmem:[#allocation1 + $0x8d] ss:$16 sm:%s1309_s0]   ;;  %v1298_v49 = vsel %vm1033_vm1, %v1296_v43, %v1293_v45  ;;  %v1450_v1 = vld [vmem:[#allocation1 + $0x18c] ss:$16 sm:%s1449_s5]   ;;  %s1391_s25 = smov 192  ;;  %s1400_s6 = smov 3 }
  0x30   :  { %v1313_v50 = vld [vmem:[#allocation1 + $0x8d] ss:$16 sm:%s1312_s28]   ;;  %v1303_v52 = vsel %vm1037_vm2, %v1301_v46, %v1298_v49  ;;  %2838 = vrot.lane.b32.xlu1 %v2837_v48, %s2964_s18  ;;  %v1452_v3 = vsel %vm1029_vm0, %v1450_v1, %v1447_v0  ;;  %v1455_v4 = vld [vmem:[#allocation1 + $0x18c] ss:$16 sm:%s1454_s12]   ;;  %s1403_s15 = smov 12  ;;  %s1408_s20 = smov 48 }
  0x31   :  { %v1318_v51 = vld [vmem:[#allocation1 + $0x8d] ss:$16 sm:%s1317_s29]   ;;  %v1315_v53 = vsel %vm1029_vm0, %v1313_v50, %v1310_v47  ;;  %v1460_v5 = vld [vmem:[#allocation1 + $0x18c] ss:$16 sm:%s1459_s13]   ;;  %v1457_v6 = vsel %vm1033_vm1, %v1455_v4, %v1452_v3  ;;  %s1413_s2 = smov 192  ;;  %s1514_s3 = smov 3 }
  0x32   :  { %v1323_v54 = vld [vmem:[#allocation1 + $0x8d] ss:$16 sm:%s1322_s30]   ;;  %v1320_v55 = vsel %vm1033_vm1, %v1318_v51, %v1315_v53  ;;  %v1379_v7 = vld [vmem:[#allocation1 + $0xc] ss:$16 sm:%s1378_s16]   ;;  %v1462_v9 = vsel %vm1037_vm2, %v1460_v5, %v1457_v6  ;;  %s2965_s8 = smov 96   ;;  %s1517_s9 = smov 12 }
  0x33   :  { %v1325_v58 = vsel %vm1037_vm2, %v1323_v54, %v1320_v55  ;;  %v1382_v8 = vld [vmem:[#allocation1 + $0xc] ss:$16 sm:%s1381_s17]   ;;  %v2847_v13 = vpack.i.bf16 %v1462_v9, %v1439_v2  ;;  %v1515_v22 = vld [vmem:[#allocation1 + $0x10b] ss:$16 sm:%s1514_s3]   ;;  %s1522_s10 = smov 48  ;;  %s1527_s11 = smov 192 }
  0x34   :  { %v2832_v62 = vpack.i.bf16 %v1325_v58, %v1303_v52  ;;  %v1384_v10 = vsel %vm1029_vm0, %v1382_v8, %v1379_v7  ;;  %v1387_v11 = vld [vmem:[#allocation1 + $0xc] ss:$16 sm:%s1386_s24]   ;;  %v1518_v24 = vld [vmem:[#allocation1 + $0x10b] ss:$16 sm:%s1517_s9]   ;;  %s1537_s14 = smov 3  ;;  %s1540_s21 = smov 12 }
  0x35   :  { %v1392_v12 = vld [vmem:[#allocation1 + $0xc] ss:$16 sm:%s1391_s25]   ;;  %v1389_v14 = vsel %vm1033_vm1, %v1387_v11, %v1384_v10  ;;  %2848 = vrot.lane.b32.xlu1 %v2847_v13, %s2965_s8  ;;  %v1523_v25 = vld [vmem:[#allocation1 + $0x10b] ss:$16 sm:%s1522_s10]   ;;  %v1520_v27 = vsel %vm1029_vm0, %v1518_v24, %v1515_v22  ;;  %s1545_s22 = smov 48  ;;  %s1550_s23 = smov 192 }
  0x36   :  { %2833 = vrot.lane.b32.xlu0 %v2832_v62, %s2964_s18  ;;  %v1401_v15 = vld [vmem:[#allocation1 + $0x8c] ss:$16 sm:%s1400_s6]   ;;  %v1394_v17 = vsel %vm1037_vm2, %v1392_v12, %v1389_v14  ;;  %v1528_v28 = vld [vmem:[#allocation1 + $0x10b] ss:$16 sm:%s1527_s11]   ;;  %v1525_v30 = vsel %vm1033_vm1, %v1523_v25, %v1520_v27  ;;  %s1469_s0 = smov 3  ;;  %s1472_s28 = smov 12 }
  0x37   :  { %v1404_v16 = vld [vmem:[#allocation1 + $0x8c] ss:$16 sm:%s1403_s15]   ;;  %v1538_v29 = vld [vmem:[#allocation1 + $0x18b] ss:$16 sm:%s1537_s14]   ;;  %v1530_v33 = vsel %vm1037_vm2, %v1528_v28, %v1525_v30  ;;  %s1477_s29 = smov 48  ;;  %s1482_s30 = smov 192 }
  0x38   :  { %v1406_v18 = vsel %vm1029_vm0, %v1404_v16, %v1401_v15  ;;  %v1409_v19 = vld [vmem:[#allocation1 + $0x8c] ss:$16 sm:%s1408_s20]   ;;  %v1541_v31 = vld [vmem:[#allocation1 + $0x18b] ss:$16 sm:%s1540_s21]   ;;  %s1491_s4 = smov 3  ;;  %s1494_s7 = smov 12 }
  0x39   :  { %v1414_v20 = vld [vmem:[#allocation1 + $0x8c] ss:$16 sm:%s1413_s2]   ;;  %v1411_v21 = vsel %vm1033_vm1, %v1409_v19, %v1406_v18  ;;  %v1546_v32 = vld [vmem:[#allocation1 + $0x18b] ss:$16 sm:%s1545_s22]   ;;  %v1543_v34 = vsel %vm1029_vm0, %v1541_v31, %v1538_v29  ;;  %s1499_s18 = smov 48  ;;  %s1504_s19 = smov 192 }
  0x3a   :  { %v1416_v23 = vsel %vm1037_vm2, %v1414_v20, %v1411_v21  ;;  %v1551_v35 = vld [vmem:[#allocation1 + $0x18b] ss:$16 sm:%s1550_s23]   ;;  %v1548_v37 = vsel %vm1033_vm1, %v1546_v32, %v1543_v34  ;;  %s1605_s26 = smov 3  ;;  %s1608_s27 = smov 12  ;;  %vm2125_vm15 = vcmask 326912  }
  0x3b   :  { %v2842_v26 = vpack.i.bf16 %v1416_v23, %v1394_v17  ;;  %v1470_v36 = vld [vmem:[#allocation1 + $0xb] ss:$16 sm:%s1469_s0]   ;;  %v1553_v40 = vsel %vm1037_vm2, %v1551_v35, %v1548_v37  ;;  %s2966_s5 = smov 88   ;;  %v1606_v52 = vld [vmem:[#allocation1 + $0x10a] ss:$16 sm:%s1605_s26]   ;;  %s1613_s12 = smov 48 }
  0x3c   :  { %v1473_v38 = vld [vmem:[#allocation1 + $0xb] ss:$16 sm:%s1472_s28]   ;;  %v2857_v44 = vpack.i.bf16 %v1553_v40, %v1530_v33  ;;  %v1609_v53 = vld [vmem:[#allocation1 + $0x10a] ss:$16 sm:%s1608_s27]   ;;  %s1618_s13 = smov 192  ;;  %s1628_s16 = smov 3 }
  0x3d   :  { %2843 = vrot.lane.b32.xlu0 %v2842_v26, %s2965_s8  ;;  %v1478_v39 = vld [vmem:[#allocation1 + $0xb] ss:$16 sm:%s1477_s29]   ;;  %v1475_v41 = vsel %vm1029_vm0, %v1473_v38, %v1470_v36  ;;  %v1611_v55 = vsel %vm1029_vm0, %v1609_v53, %v1606_v52  ;;  %v1614_v56 = vld [vmem:[#allocation1 + $0x10a] ss:$16 sm:%s1613_s12]   ;;  %s1631_s17 = smov 12  ;;  %s1636_s24 = smov 48 }
  0x3e   :  { %v1483_v42 = vld [vmem:[#allocation1 + $0xb] ss:$16 sm:%s1482_s30]   ;;  %v1480_v45 = vsel %vm1033_vm1, %v1478_v39, %v1475_v41  ;;  %2858 = vrot.lane.b32.xlu1 %v2857_v44, %s2966_s5  ;;  %v1619_v57 = vld [vmem:[#allocation1 + $0x10a] ss:$16 sm:%s1618_s13]   ;;  %v1616_v59 = vsel %vm1033_vm1, %v1614_v56, %v1611_v55  ;;  %s1641_s25 = smov 192  ;;  %s1560_s6 = smov 3 }
  0x3f   :  { %v1492_v43 = vld [vmem:[#allocation1 + $0x8b] ss:$16 sm:%s1491_s4]   ;;  %v1485_v48 = vsel %vm1037_vm2, %v1483_v42, %v1480_v45  ;;  %v1629_v60 = vld [vmem:[#allocation1 + $0x18a] ss:$16 sm:%s1628_s16]   ;;  %v1621_v62 = vsel %vm1037_vm2, %v1619_v57, %v1616_v59  ;;  %s1563_s15 = smov 12  ;;  %s1568_s20 = smov 48 }
  0x40   :  { %v1495_v46 = vld [vmem:[#allocation1 + $0x8b] ss:$16 sm:%s1494_s7]   ;;  %v1632_v61 = vld [vmem:[#allocation1 + $0x18a] ss:$16 sm:%s1631_s17]   ;;  %s1573_s2 = smov 192  ;;  %s1582_s3 = smov 3 }
  0x41   :  { %v1500_v47 = vld [vmem:[#allocation1 + $0x8b] ss:$16 sm:%s1499_s18]   ;;  %v1497_v49 = vsel %vm1029_vm0, %v1495_v46, %v1492_v43  ;;  %v1634_v63 = vsel %vm1029_vm0, %v1632_v61, %v1629_v60  ;;  %v1637_v0 = vld [vmem:[#allocation1 + $0x18a] ss:$16 sm:%s1636_s24]   ;;  %s1585_s8 = smov 12  ;;  %s1590_s9 = smov 48 }
  0x42   :  { %v1505_v50 = vld [vmem:[#allocation1 + $0x8b] ss:$16 sm:%s1504_s19]   ;;  %v1502_v51 = vsel %vm1033_vm1, %v1500_v47, %v1497_v49  ;;  %v1642_v1 = vld [vmem:[#allocation1 + $0x18a] ss:$16 sm:%s1641_s25]   ;;  %v1639_v2 = vsel %vm1033_vm1, %v1637_v0, %v1634_v63  ;;  %s1595_s10 = smov 192  ;;  %s1696_s11 = smov 3 }
  0x43   :  { %v1507_v54 = vsel %vm1037_vm2, %v1505_v50, %v1502_v51  ;;  %v1561_v3 = vld [vmem:[#allocation1 + $0xa] ss:$16 sm:%s1560_s6]   ;;  %v1644_v5 = vsel %vm1037_vm2, %v1642_v1, %v1639_v2  ;;  %s2967_s14 = smov 80   ;;  %v1697_v18 = vld [vmem:[#allocation1 + $0x109] ss:$16 sm:%s1696_s11]   ;;  %s1699_s21 = smov 12 }
  0x44   :  { %v2852_v58 = vpack.i.bf16 %v1507_v54, %v1485_v48  ;;  %v1564_v4 = vld [vmem:[#allocation1 + $0xa] ss:$16 sm:%s1563_s15]   ;;  %v2867_v9 = vpack.i.bf16 %v1644_v5, %v1621_v62  ;;  %s1704_s22 = smov 48  ;;  %v1700_v20 = vld [vmem:[#allocation1 + $0x109] ss:$16 sm:%s1699_s21]   ;;  %s1709_s23 = smov 192 }
  0x45   :  { %v1566_v6 = vsel %vm1029_vm0, %v1564_v4, %v1561_v3  ;;  %v1569_v7 = vld [vmem:[#allocation1 + $0xa] ss:$16 sm:%s1568_s20]   ;;  %v1705_v21 = vld [vmem:[#allocation1 + $0x109] ss:$16 sm:%s1704_s22]   ;;  %s1719_s0 = smov 3  ;;  %v1702_v23 = vsel %vm1029_vm0, %v1700_v20, %v1697_v18  ;;  %s1722_s28 = smov 12 }
  0x46   :  { %2853 = vrot.lane.b32.xlu0 %v2852_v58, %s2966_s5  ;;  %v1574_v8 = vld [vmem:[#allocation1 + $0xa] ss:$16 sm:%s1573_s2]   ;;  %v1571_v10 = vsel %vm1033_vm1, %v1569_v7, %v1566_v6  ;;  %2868 = vrot.lane.b32.xlu1 %v2867_v9, %s2967_s14  ;;  %v1710_v24 = vld [vmem:[#allocation1 + $0x109] ss:$16 sm:%s1709_s23]   ;;  %s1727_s29 = smov 48  ;;  %v1707_v26 = vsel %vm1033_vm1, %v1705_v21, %v1702_v23  ;;  %s1732_s30 = smov 192 }
  0x47   :  { %v1583_v11 = vld [vmem:[#allocation1 + $0x8a] ss:$16 sm:%s1582_s3]   ;;  %v1576_v13 = vsel %vm1037_vm2, %v1574_v8, %v1571_v10  ;;  %v1720_v25 = vld [vmem:[#allocation1 + $0x189] ss:$16 sm:%s1719_s0]   ;;  %s1651_s4 = smov 3  ;;  %v1712_v29 = vsel %vm1037_vm2, %v1710_v24, %v1707_v26  ;;  %s1654_s7 = smov 12 }
  0x48   :  { %v1586_v12 = vld [vmem:[#allocation1 + $0x8a] ss:$16 sm:%s1585_s8]   ;;  %v1723_v27 = vld [vmem:[#allocation1 + $0x189] ss:$16 sm:%s1722_s28]   ;;  %s1659_s18 = smov 48  ;;  %s1664_s19 = smov 192 }
  0x49   :  { %v1588_v14 = vsel %vm1029_vm0, %v1586_v12, %v1583_v11  ;;  %v1591_v15 = vld [vmem:[#allocation1 + $0x8a] ss:$16 sm:%s1590_s9]   ;;  %v1728_v28 = vld [vmem:[#allocation1 + $0x189] ss:$16 sm:%s1727_s29]   ;;  %v1725_v30 = vsel %vm1029_vm0, %v1723_v27, %v1720_v25  ;;  %s1673_s26 = smov 3  ;;  %s1676_s27 = smov 12 }
  0x4a   :  { %v1596_v16 = vld [vmem:[#allocation1 + $0x8a] ss:$16 sm:%s1595_s10]   ;;  %v1593_v17 = vsel %vm1033_vm1, %v1591_v15, %v1588_v14  ;;  %v1733_v31 = vld [vmem:[#allocation1 + $0x189] ss:$16 sm:%s1732_s30]   ;;  %v1730_v33 = vsel %vm1033_vm1, %v1728_v28, %v1725_v30  ;;  %s1681_s5 = smov 48  ;;  %s1686_s12 = smov 192 }
  0x4b   :  { %v1598_v19 = vsel %vm1037_vm2, %v1596_v16, %v1593_v17  ;;  %v1652_v32 = vld [vmem:[#allocation1 + $0x9] ss:$16 sm:%s1651_s4]   ;;  %v1735_v36 = vsel %vm1037_vm2, %v1733_v31, %v1730_v33  ;;  %s1787_s13 = smov 3  ;;  %s1790_s16 = smov 12 }
  0x4c   :  { %v2862_v22 = vpack.i.bf16 %v1598_v19, %v1576_v13  ;;  %v1655_v34 = vld [vmem:[#allocation1 + $0x9] ss:$16 sm:%s1654_s7]   ;;  %v2877_v40 = vpack.i.bf16 %v1735_v36, %v1712_v29  ;;  %s2968_s17 = smov 72   ;;  %v1788_v48 = vld [vmem:[#allocation1 + $0x108] ss:$16 sm:%s1787_s13]   ;;  %s1795_s24 = smov 48 }
  0x4d   :  { %v1660_v35 = vld [vmem:[#allocation1 + $0x9] ss:$16 sm:%s1659_s18]   ;;  %v1657_v37 = vsel %vm1029_vm0, %v1655_v34, %v1652_v32  ;;  %v1791_v49 = vld [vmem:[#allocation1 + $0x108] ss:$16 sm:%s1790_s16]   ;;  %s1800_s25 = smov 192  ;;  %s1810_s6 = smov 3 }
  0x4e   :  { %2863 = vrot.lane.b32.xlu0 %v2862_v22, %s2967_s14  ;;  %v1665_v38 = vld [vmem:[#allocation1 + $0x9] ss:$16 sm:%s1664_s19]   ;;  %v1662_v41 = vsel %vm1033_vm1, %v1660_v35, %v1657_v37  ;;  %2878 = vrot.lane.b32.xlu1 %v2877_v40, %s2968_s17  ;;  %v1793_v51 = vsel %vm1029_vm0, %v1791_v49, %v1788_v48  ;;  %v1796_v52 = vld [vmem:[#allocation1 + $0x108] ss:$16 sm:%s1795_s24]   ;;  %s1813_s15 = smov 12  ;;  %s1818_s20 = smov 48 }
  0x4f   :  { %v1674_v39 = vld [vmem:[#allocation1 + $0x89] ss:$16 sm:%s1673_s26]   ;;  %v1667_v44 = vsel %vm1037_vm2, %v1665_v38, %v1662_v41  ;;  %v1801_v53 = vld [vmem:[#allocation1 + $0x108] ss:$16 sm:%s1800_s25]   ;;  %v1798_v55 = vsel %vm1033_vm1, %v1796_v52, %v1793_v51  ;;  %s1823_s2 = smov 192  ;;  %s1742_s3 = smov 3 }
  0x50   :  { %v1677_v42 = vld [vmem:[#allocation1 + $0x89] ss:$16 sm:%s1676_s27]   ;;  %v1811_v56 = vld [vmem:[#allocation1 + $0x188] ss:$16 sm:%s1810_s6]   ;;  %v1803_v58 = vsel %vm1037_vm2, %v1801_v53, %v1798_v55  ;;  %s1745_s8 = smov 12  ;;  %s1750_s9 = smov 48 }
  0x51   :  { %v1682_v43 = vld [vmem:[#allocation1 + $0x89] ss:$16 sm:%s1681_s5]   ;;  %v1679_v45 = vsel %vm1029_vm0, %v1677_v42, %v1674_v39  ;;  %v1814_v57 = vld [vmem:[#allocation1 + $0x188] ss:$16 sm:%s1813_s15]   ;;  %s1755_s10 = smov 192  ;;  %s1764_s11 = smov 3 }
  0x52   :  { %v1687_v46 = vld [vmem:[#allocation1 + $0x89] ss:$16 sm:%s1686_s12]   ;;  %v1684_v47 = vsel %vm1033_vm1, %v1682_v43, %v1679_v45  ;;  %v1816_v59 = vsel %vm1029_vm0, %v1814_v57, %v1811_v56  ;;  %v1819_v60 = vld [vmem:[#allocation1 + $0x188] ss:$16 sm:%s1818_s20]   ;;  %s1767_s14 = smov 12  ;;  %s1772_s21 = smov 48 }
  0x53   :  { %v1689_v50 = vsel %vm1037_vm2, %v1687_v46, %v1684_v47  ;;  %v1824_v61 = vld [vmem:[#allocation1 + $0x188] ss:$16 sm:%s1823_s2]   ;;  %v1821_v62 = vsel %vm1033_vm1, %v1819_v60, %v1816_v59  ;;  %s1777_s22 = smov 192  ;;  %s1833_s23 = smov 3 }
  0x54   :  { %v2872_v54 = vpack.i.bf16 %v1689_v50, %v1667_v44  ;;  %v1743_v63 = vld [vmem:[#allocation1 + $0x8] ss:$16 sm:%s1742_s3]   ;;  %v1826_v1 = vsel %vm1037_vm2, %v1824_v61, %v1821_v62  ;;  %s1836_s0 = smov 12  ;;  %s2969_s28 = smov 64   ;;  %v1834_v14 = vld [vmem:[#allocation1 + $0x7] ss:$16 sm:%s1833_s23]  }
  0x55   :  { %v1746_v0 = vld [vmem:[#allocation1 + $0x8] ss:$16 sm:%s1745_s8]   ;;  %v2887_v5 = vpack.i.bf16 %v1826_v1, %v1803_v58  ;;  %v1837_v15 = vld [vmem:[#allocation1 + $0x7] ss:$16 sm:%s1836_s0]   ;;  %s1841_s29 = smov 48  ;;  %s1846_s30 = smov 192 }
  0x56   :  { %2873 = vrot.lane.b32.xlu0 %v2872_v54, %s2968_s17  ;;  %v1748_v2 = vsel %vm1029_vm0, %v1746_v0, %v1743_v63  ;;  %v1751_v3 = vld [vmem:[#allocation1 + $0x8] ss:$16 sm:%s1750_s9]   ;;  %v1839_v17 = vsel %vm1029_vm0, %v1837_v15, %v1834_v14  ;;  %v1842_v18 = vld [vmem:[#allocation1 + $0x7] ss:$16 sm:%s1841_s29]   ;;  %s1855_s4 = smov 3  ;;  %s1858_s7 = smov 12 }
  0x57   :  { %v1756_v4 = vld [vmem:[#allocation1 + $0x8] ss:$16 sm:%s1755_s10]   ;;  %v1753_v6 = vsel %vm1033_vm1, %v1751_v3, %v1748_v2  ;;  %2888 = vrot.lane.b32.xlu1 %v2887_v5, %s2969_s28  ;;  %v1847_v19 = vld [vmem:[#allocation1 + $0x7] ss:$16 sm:%s1846_s30]   ;;  %v1844_v21 = vsel %vm1033_vm1, %v1842_v18, %v1839_v17  ;;  %s1863_s18 = smov 48  ;;  %s1868_s19 = smov 192 }
  0x58   :  { %v1765_v7 = vld [vmem:[#allocation1 + $0x88] ss:$16 sm:%s1764_s11]   ;;  %v1758_v9 = vsel %vm1037_vm2, %v1756_v4, %v1753_v6  ;;  %v1856_v22 = vld [vmem:[#allocation1 + $0x87] ss:$16 sm:%s1855_s4]   ;;  %s1878_s26 = smov 3  ;;  %v1849_v25 = vsel %vm1037_vm2, %v1847_v19, %v1844_v21  ;;  %s1881_s27 = smov 12 }
  0x59   :  { %v1768_v8 = vld [vmem:[#allocation1 + $0x88] ss:$16 sm:%s1767_s14]   ;;  %v1859_v23 = vld [vmem:[#allocation1 + $0x87] ss:$16 sm:%s1858_s7]   ;;  %s1886_s5 = smov 48  ;;  %s1891_s12 = smov 192 }
  0x5a   :  { %v1770_v10 = vsel %vm1029_vm0, %v1768_v8, %v1765_v7  ;;  %v1773_v11 = vld [vmem:[#allocation1 + $0x88] ss:$16 sm:%s1772_s21]   ;;  %v1864_v24 = vld [vmem:[#allocation1 + $0x87] ss:$16 sm:%s1863_s18]   ;;  %v1861_v26 = vsel %vm1029_vm0, %v1859_v23, %v1856_v22  ;;  %s1901_s13 = smov 3  ;;  %s1904_s16 = smov 12 }
  0x5b   :  { %v1778_v12 = vld [vmem:[#allocation1 + $0x88] ss:$16 sm:%s1777_s22]   ;;  %v1775_v13 = vsel %vm1033_vm1, %v1773_v11, %v1770_v10  ;;  %v1869_v27 = vld [vmem:[#allocation1 + $0x87] ss:$16 sm:%s1868_s19]   ;;  %v1866_v29 = vsel %vm1033_vm1, %v1864_v24, %v1861_v26  ;;  %s1909_s17 = smov 48  ;;  %s1914_s24 = smov 192 }
  0x5c   :  { %v1780_v16 = vsel %vm1037_vm2, %v1778_v12, %v1775_v13  ;;  %v1879_v28 = vld [vmem:[#allocation1 + $0x107] ss:$16 sm:%s1878_s26]   ;;  %v1871_v32 = vsel %vm1037_vm2, %v1869_v27, %v1866_v29  ;;  %s1924_s25 = smov 3  ;;  %s1927_s6 = smov 12 }
  0x5d   :  { %v2882_v20 = vpack.i.bf16 %v1780_v16, %v1758_v9  ;;  %v1882_v30 = vld [vmem:[#allocation1 + $0x107] ss:$16 sm:%s1881_s27]   ;;  %v2892_v36 = vpack.i.bf16 %v1871_v32, %v1849_v25  ;;  %v1925_v43 = vld [vmem:[#allocation1 + $0x6] ss:$16 sm:%s1924_s25]   ;;  %s1932_s15 = smov 48  ;;  %s2970_s20 = smov 56  }
  0x5e   :  { %v1887_v31 = vld [vmem:[#allocation1 + $0x107] ss:$16 sm:%s1886_s5]   ;;  %v1884_v33 = vsel %vm1029_vm0, %v1882_v30, %v1879_v28  ;;  %v1928_v45 = vld [vmem:[#allocation1 + $0x6] ss:$16 sm:%s1927_s6]   ;;  %s1937_s2 = smov 192  ;;  %s1946_s3 = smov 3 }
  0x5f   :  { %2883 = vrot.lane.b32.xlu0 %v2882_v20, %s2969_s28  ;;  %v1892_v34 = vld [vmem:[#allocation1 + $0x107] ss:$16 sm:%s1891_s12]   ;;  %v1889_v37 = vsel %vm1033_vm1, %v1887_v31, %v1884_v33  ;;  %v1933_v46 = vld [vmem:[#allocation1 + $0x6] ss:$16 sm:%s1932_s15]   ;;  %v1930_v48 = vsel %vm1029_vm0, %v1928_v45, %v1925_v43  ;;  %s1949_s8 = smov 12  ;;  %s1954_s9 = smov 48 }
  0x60   :  { %v1902_v35 = vld [vmem:[#allocation1 + $0x187] ss:$16 sm:%s1901_s13]   ;;  %v1894_v40 = vsel %vm1037_vm2, %v1892_v34, %v1889_v37  ;;  %v1938_v49 = vld [vmem:[#allocation1 + $0x6] ss:$16 sm:%s1937_s2]   ;;  %v1935_v51 = vsel %vm1033_vm1, %v1933_v46, %v1930_v48  ;;  %s1959_s10 = smov 192  ;;  %s1969_s11 = smov 3 }
  0x61   :  { %v1905_v38 = vld [vmem:[#allocation1 + $0x187] ss:$16 sm:%s1904_s16]   ;;  %v1947_v52 = vld [vmem:[#allocation1 + $0x86] ss:$16 sm:%s1946_s3]   ;;  %v1940_v54 = vsel %vm1037_vm2, %v1938_v49, %v1935_v51  ;;  %s1972_s14 = smov 12  ;;  %s1977_s21 = smov 48 }
  0x62   :  { %v1910_v39 = vld [vmem:[#allocation1 + $0x187] ss:$16 sm:%s1909_s17]   ;;  %v1907_v41 = vsel %vm1029_vm0, %v1905_v38, %v1902_v35  ;;  %v1950_v53 = vld [vmem:[#allocation1 + $0x86] ss:$16 sm:%s1949_s8]   ;;  %s1982_s22 = smov 192  ;;  %s1992_s23 = smov 3 }
  0x63   :  { %v1915_v42 = vld [vmem:[#allocation1 + $0x187] ss:$16 sm:%s1914_s24]   ;;  %2893 = vrot.lane.b32.xlu0 %v2892_v36, %s2970_s20  ;;  %v1912_v44 = vsel %vm1033_vm1, %v1910_v39, %v1907_v41  ;;  %v1952_v55 = vsel %vm1029_vm0, %v1950_v53, %v1947_v52  ;;  %v1955_v56 = vld [vmem:[#allocation1 + $0x86] ss:$16 sm:%s1954_s9]   ;;  %s1995_s0 = smov 12  ;;  %s2000_s28 = smov 48 }
  0x64   :  { %v1917_v47 = vsel %vm1037_vm2, %v1915_v42, %v1912_v44  ;;  %v1960_v57 = vld [vmem:[#allocation1 + $0x86] ss:$16 sm:%s1959_s10]   ;;  %v1957_v58 = vsel %vm1033_vm1, %v1955_v56, %v1952_v55  ;;  %s2005_s29 = smov 192  ;;  %s2015_s30 = smov 3 }
  0x65   :  { %v2897_v50 = vpack.i.bf16 %v1917_v47, %v1894_v40  ;;  %v1970_v59 = vld [vmem:[#allocation1 + $0x106] ss:$16 sm:%s1969_s11]   ;;  %v1962_v61 = vsel %vm1037_vm2, %v1960_v57, %v1957_v58  ;;  %s2018_s4 = smov 12  ;;  %s2971_s7 = smov 48   ;;  %v2016_v10 = vld [vmem:[#allocation1 + $0x5] ss:$16 sm:%s2015_s30]  }
  0x66   :  { %v1973_v60 = vld [vmem:[#allocation1 + $0x106] ss:$16 sm:%s1972_s14]   ;;  %v2902_v1 = vpack.i.bf16 %v1962_v61, %v1940_v54  ;;  %v2019_v11 = vld [vmem:[#allocation1 + $0x5] ss:$16 sm:%s2018_s4]   ;;  %s2023_s18 = smov 48  ;;  %s2028_s19 = smov 192 }
  0x67   :  { %2898 = vrot.lane.b32.xlu1 %v2897_v50, %s2970_s20  ;;  %v1975_v62 = vsel %vm1029_vm0, %v1973_v60, %v1970_v59  ;;  %v1978_v63 = vld [vmem:[#allocation1 + $0x106] ss:$16 sm:%s1977_s21]   ;;  %v2021_v13 = vsel %vm1029_vm0, %v2019_v11, %v2016_v10  ;;  %v2024_v14 = vld [vmem:[#allocation1 + $0x5] ss:$16 sm:%s2023_s18]   ;;  %s2037_s26 = smov 3  ;;  %s2040_s27 = smov 12 }
  0x68   :  { %v1983_v0 = vld [vmem:[#allocation1 + $0x106] ss:$16 sm:%s1982_s22]   ;;  %v1980_v2 = vsel %vm1033_vm1, %v1978_v63, %v1975_v62  ;;  %2903 = vrot.lane.b32.xlu0 %v2902_v1, %s2971_s7  ;;  %v2029_v15 = vld [vmem:[#allocation1 + $0x5] ss:$16 sm:%s2028_s19]   ;;  %v2026_v17 = vsel %vm1033_vm1, %v2024_v14, %v2021_v13  ;;  %s2045_s5 = smov 48  ;;  %s2050_s12 = smov 192 }
  0x69   :  { %v1993_v3 = vld [vmem:[#allocation1 + $0x186] ss:$16 sm:%s1992_s23]   ;;  %v1985_v5 = vsel %vm1037_vm2, %v1983_v0, %v1980_v2  ;;  %v2038_v18 = vld [vmem:[#allocation1 + $0x85] ss:$16 sm:%s2037_s26]   ;;  %s2060_s13 = smov 3  ;;  %v2031_v21 = vsel %vm1037_vm2, %v2029_v15, %v2026_v17  ;;  %s2063_s16 = smov 12 }
  0x6a   :  { %v1996_v4 = vld [vmem:[#allocation1 + $0x186] ss:$16 sm:%s1995_s0]   ;;  %v2041_v19 = vld [vmem:[#allocation1 + $0x85] ss:$16 sm:%s2040_s27]   ;;  %s2068_s17 = smov 48  ;;  %s2073_s24 = smov 192 }
  0x6b   :  { %v1998_v6 = vsel %vm1029_vm0, %v1996_v4, %v1993_v3  ;;  %v2001_v7 = vld [vmem:[#allocation1 + $0x186] ss:$16 sm:%s2000_s28]   ;;  %v2046_v20 = vld [vmem:[#allocation1 + $0x85] ss:$16 sm:%s2045_s5]   ;;  %v2043_v22 = vsel %vm1029_vm0, %v2041_v19, %v2038_v18  ;;  %s2083_s25 = smov 3  ;;  %s2086_s6 = smov 12 }
  0x6c   :  { %v2006_v8 = vld [vmem:[#allocation1 + $0x186] ss:$16 sm:%s2005_s29]   ;;  %v2003_v9 = vsel %vm1033_vm1, %v2001_v7, %v1998_v6  ;;  %v2051_v23 = vld [vmem:[#allocation1 + $0x85] ss:$16 sm:%s2050_s12]   ;;  %v2048_v25 = vsel %vm1033_vm1, %v2046_v20, %v2043_v22  ;;  %s2091_s15 = smov 48  ;;  %s2096_s20 = smov 192 }
  0x6d   :  { %v2008_v12 = vsel %vm1037_vm2, %v2006_v8, %v2003_v9  ;;  %v2061_v24 = vld [vmem:[#allocation1 + $0x105] ss:$16 sm:%s2060_s13]   ;;  %v2053_v28 = vsel %vm1037_vm2, %v2051_v23, %v2048_v25  ;;  %s2106_s2 = smov 3  ;;  %s2109_s3 = smov 12 }
  0x6e   :  { %v2907_v16 = vpack.i.bf16 %v2008_v12, %v1985_v5  ;;  %v2064_v26 = vld [vmem:[#allocation1 + $0x105] ss:$16 sm:%s2063_s16]   ;;  %v2912_v32 = vpack.i.bf16 %v2053_v28, %v2031_v21  ;;  %v2107_v39 = vld [vmem:[#allocation1 + $0x4] ss:$16 sm:%s2106_s2]   ;;  %s2114_s8 = smov 48  ;;  %s2972_s9 = smov 40  }
  0x6f   :  { %v2069_v27 = vld [vmem:[#allocation1 + $0x105] ss:$16 sm:%s2068_s17]   ;;  %v2066_v29 = vsel %vm1029_vm0, %v2064_v26, %v2061_v24  ;;  %v2110_v41 = vld [vmem:[#allocation1 + $0x4] ss:$16 sm:%s2109_s3]   ;;  %s2119_s10 = smov 192  ;;  %s2128_s11 = smov 3 }
  0x70   :  { %2908 = vrot.lane.b32.xlu1 %v2907_v16, %s2971_s7  ;;  %v2074_v30 = vld [vmem:[#allocation1 + $0x105] ss:$16 sm:%s2073_s24]   ;;  %v2071_v33 = vsel %vm1033_vm1, %v2069_v27, %v2066_v29  ;;  %2913 = vrot.lane.b32.xlu0 %v2912_v32, %s2972_s9  ;;  %v2115_v42 = vld [vmem:[#allocation1 + $0x4] ss:$16 sm:%s2114_s8]   ;;  %v2112_v44 = vsel %vm1029_vm0, %v2110_v41, %v2107_v39  ;;  %s2131_s14 = smov 12  ;;  %s2136_s21 = smov 48 }
  0x71   :  { %v2084_v31 = vld [vmem:[#allocation1 + $0x185] ss:$16 sm:%s2083_s25]   ;;  %v2076_v36 = vsel %vm1037_vm2, %v2074_v30, %v2071_v33  ;;  %v2120_v45 = vld [vmem:[#allocation1 + $0x4] ss:$16 sm:%s2119_s10]   ;;  %v2117_v47 = vsel %vm1033_vm1, %v2115_v42, %v2112_v44  ;;  %s2141_s22 = smov 192  ;;  %s2151_s23 = smov 3 }
  0x72   :  { %v2087_v34 = vld [vmem:[#allocation1 + $0x185] ss:$16 sm:%s2086_s6]   ;;  %v2129_v48 = vld [vmem:[#allocation1 + $0x84] ss:$16 sm:%s2128_s11]   ;;  %v2122_v50 = vsel %vm1037_vm2, %v2120_v45, %v2117_v47  ;;  %s2154_s0 = smov 12  ;;  %s2159_s28 = smov 48 }
  0x73   :  { %v2092_v35 = vld [vmem:[#allocation1 + $0x185] ss:$16 sm:%s2091_s15]   ;;  %v2089_v37 = vsel %vm1029_vm0, %v2087_v34, %v2084_v31  ;;  %v2132_v49 = vld [vmem:[#allocation1 + $0x84] ss:$16 sm:%s2131_s14]   ;;  %s2164_s29 = smov 192  ;;  %s2174_s30 = smov 3 }
  0x74   :  { %v2097_v38 = vld [vmem:[#allocation1 + $0x185] ss:$16 sm:%s2096_s20]   ;;  %v2094_v40 = vsel %vm1033_vm1, %v2092_v35, %v2089_v37  ;;  %v2134_v51 = vsel %vm1029_vm0, %v2132_v49, %v2129_v48  ;;  %v2137_v52 = vld [vmem:[#allocation1 + $0x84] ss:$16 sm:%s2136_s21]   ;;  %s2177_s4 = smov 12  ;;  %s2182_s7 = smov 48 }
  0x75   :  { %v2099_v43 = vsel %vm1037_vm2, %v2097_v38, %v2094_v40  ;;  %v2142_v53 = vld [vmem:[#allocation1 + $0x84] ss:$16 sm:%s2141_s22]   ;;  %v2139_v54 = vsel %vm1033_vm1, %v2137_v52, %v2134_v51  ;;  %s2187_s18 = smov 192  ;;  %s2197_s19 = smov 3 }
  0x76   :  { %v2917_v46 = vpack.i.bf16 %v2099_v43, %v2076_v36  ;;  %v2152_v55 = vld [vmem:[#allocation1 + $0x104] ss:$16 sm:%s2151_s23]   ;;  %v2144_v57 = vsel %vm1037_vm2, %v2142_v53, %v2139_v54  ;;  %s2200_s26 = smov 12  ;;  %s2973_s27 = smov 32   ;;  %v2198_v6 = vld [vmem:[#allocation1 + $0x3] ss:$16 sm:%s2197_s19]  }
  0x77   :  { %v2155_v56 = vld [vmem:[#allocation1 + $0x104] ss:$16 sm:%s2154_s0]   ;;  %v2922_v61 = vpack.i.bf16 %v2144_v57, %v2122_v50  ;;  %v2201_v7 = vld [vmem:[#allocation1 + $0x3] ss:$16 sm:%s2200_s26]   ;;  %s2205_s5 = smov 48  ;;  %s2210_s12 = smov 192 }
  0x78   :  { %2918 = vrot.lane.b32.xlu1 %v2917_v46, %s2972_s9  ;;  %v2157_v58 = vsel %vm1029_vm0, %v2155_v56, %v2152_v55  ;;  %v2160_v59 = vld [vmem:[#allocation1 + $0x104] ss:$16 sm:%s2159_s28]   ;;  %v2203_v9 = vsel %vm1029_vm0, %v2201_v7, %v2198_v6  ;;  %v2206_v10 = vld [vmem:[#allocation1 + $0x3] ss:$16 sm:%s2205_s5]   ;;  %s2219_s13 = smov 3  ;;  %s2222_s16 = smov 12 }
  0x79   :  { %v2165_v60 = vld [vmem:[#allocation1 + $0x104] ss:$16 sm:%s2164_s29]   ;;  %v2162_v62 = vsel %vm1033_vm1, %v2160_v59, %v2157_v58  ;;  %2923 = vrot.lane.b32.xlu0 %v2922_v61, %s2973_s27  ;;  %v2211_v11 = vld [vmem:[#allocation1 + $0x3] ss:$16 sm:%s2210_s12]   ;;  %v2208_v13 = vsel %vm1033_vm1, %v2206_v10, %v2203_v9  ;;  %s2227_s17 = smov 48  ;;  %s2232_s24 = smov 192 }
  0x7a   :  { %v2175_v63 = vld [vmem:[#allocation1 + $0x184] ss:$16 sm:%s2174_s30]   ;;  %v2167_v1 = vsel %vm1037_vm2, %v2165_v60, %v2162_v62  ;;  %v2220_v14 = vld [vmem:[#allocation1 + $0x83] ss:$16 sm:%s2219_s13]   ;;  %s2242_s25 = smov 3  ;;  %v2213_v17 = vsel %vm1037_vm2, %v2211_v11, %v2208_v13  ;;  %s2245_s6 = smov 12 }
  0x7b   :  { %v2178_v0 = vld [vmem:[#allocation1 + $0x184] ss:$16 sm:%s2177_s4]   ;;  %v2223_v15 = vld [vmem:[#allocation1 + $0x83] ss:$16 sm:%s2222_s16]   ;;  %s2250_s15 = smov 48  ;;  %s2255_s20 = smov 192 }
  0x7c   :  { %v2180_v2 = vsel %vm1029_vm0, %v2178_v0, %v2175_v63  ;;  %v2183_v3 = vld [vmem:[#allocation1 + $0x184] ss:$16 sm:%s2182_s7]   ;;  %v2228_v16 = vld [vmem:[#allocation1 + $0x83] ss:$16 sm:%s2227_s17]   ;;  %v2225_v18 = vsel %vm1029_vm0, %v2223_v15, %v2220_v14  ;;  %s2265_s2 = smov 3  ;;  %s2268_s3 = smov 12 }
  0x7d   :  { %v2188_v4 = vld [vmem:[#allocation1 + $0x184] ss:$16 sm:%s2187_s18]   ;;  %v2185_v5 = vsel %vm1033_vm1, %v2183_v3, %v2180_v2  ;;  %v2233_v19 = vld [vmem:[#allocation1 + $0x83] ss:$16 sm:%s2232_s24]   ;;  %v2230_v21 = vsel %vm1033_vm1, %v2228_v16, %v2225_v18  ;;  %s2273_s8 = smov 48  ;;  %s2278_s9 = smov 192 }
  0x7e   :  { %v2190_v8 = vsel %vm1037_vm2, %v2188_v4, %v2185_v5  ;;  %v2243_v20 = vld [vmem:[#allocation1 + $0x103] ss:$16 sm:%s2242_s25]   ;;  %v2235_v24 = vsel %vm1037_vm2, %v2233_v19, %v2230_v21  ;;  %s2288_s10 = smov 3  ;;  %s2291_s11 = smov 12 }
  0x7f   :  { %v2927_v12 = vpack.i.bf16 %v2190_v8, %v2167_v1  ;;  %v2246_v22 = vld [vmem:[#allocation1 + $0x103] ss:$16 sm:%s2245_s6]   ;;  %v2932_v28 = vpack.i.bf16 %v2235_v24, %v2213_v17  ;;  %v2289_v35 = vld [vmem:[#allocation1 + $0x2] ss:$16 sm:%s2288_s10]   ;;  %s2296_s14 = smov 48  ;;  %s2974_s21 = smov 24  }
  0x80   :  { %v2251_v23 = vld [vmem:[#allocation1 + $0x103] ss:$16 sm:%s2250_s15]   ;;  %v2248_v25 = vsel %vm1029_vm0, %v2246_v22, %v2243_v20  ;;  %v2292_v37 = vld [vmem:[#allocation1 + $0x2] ss:$16 sm:%s2291_s11]   ;;  %s2301_s22 = smov 192  ;;  %s2310_s23 = smov 3 }
  0x81   :  { %2928 = vrot.lane.b32.xlu1 %v2927_v12, %s2973_s27  ;;  %v2256_v26 = vld [vmem:[#allocation1 + $0x103] ss:$16 sm:%s2255_s20]   ;;  %v2253_v29 = vsel %vm1033_vm1, %v2251_v23, %v2248_v25  ;;  %2933 = vrot.lane.b32.xlu0 %v2932_v28, %s2974_s21  ;;  %v2297_v38 = vld [vmem:[#allocation1 + $0x2] ss:$16 sm:%s2296_s14]   ;;  %v2294_v40 = vsel %vm1029_vm0, %v2292_v37, %v2289_v35  ;;  %s2313_s0 = smov 12  ;;  %s2318_s28 = smov 48 }
  0x82   :  { %v2266_v27 = vld [vmem:[#allocation1 + $0x183] ss:$16 sm:%s2265_s2]   ;;  %v2258_v32 = vsel %vm1037_vm2, %v2256_v26, %v2253_v29  ;;  %v2302_v41 = vld [vmem:[#allocation1 + $0x2] ss:$16 sm:%s2301_s22]   ;;  %v2299_v43 = vsel %vm1033_vm1, %v2297_v38, %v2294_v40  ;;  %s2323_s29 = smov 192  ;;  %s2333_s30 = smov 3 }
  0x83   :  { %v2269_v30 = vld [vmem:[#allocation1 + $0x183] ss:$16 sm:%s2268_s3]   ;;  %v2311_v44 = vld [vmem:[#allocation1 + $0x82] ss:$16 sm:%s2310_s23]   ;;  %v2304_v46 = vsel %vm1037_vm2, %v2302_v41, %v2299_v43  ;;  %s2336_s4 = smov 12  ;;  %s2341_s7 = smov 48 }
  0x84   :  { %v2274_v31 = vld [vmem:[#allocation1 + $0x183] ss:$16 sm:%s2273_s8]   ;;  %v2271_v33 = vsel %vm1029_vm0, %v2269_v30, %v2266_v27  ;;  %v2314_v45 = vld [vmem:[#allocation1 + $0x82] ss:$16 sm:%s2313_s0]   ;;  %s2346_s18 = smov 192  ;;  %s2356_s19 = smov 3 }
  0x85   :  { %v2279_v34 = vld [vmem:[#allocation1 + $0x183] ss:$16 sm:%s2278_s9]   ;;  %v2276_v36 = vsel %vm1033_vm1, %v2274_v31, %v2271_v33  ;;  %v2316_v47 = vsel %vm1029_vm0, %v2314_v45, %v2311_v44  ;;  %v2319_v48 = vld [vmem:[#allocation1 + $0x82] ss:$16 sm:%s2318_s28]   ;;  %s2359_s26 = smov 12  ;;  %s2364_s27 = smov 48 }
  0x86   :  { %v2281_v39 = vsel %vm1037_vm2, %v2279_v34, %v2276_v36  ;;  %v2324_v49 = vld [vmem:[#allocation1 + $0x82] ss:$16 sm:%s2323_s29]   ;;  %v2321_v50 = vsel %vm1033_vm1, %v2319_v48, %v2316_v47  ;;  %s2369_s5 = smov 192  ;;  %s2379_s12 = smov 3 }
  0x87   :  { %v2937_v42 = vpack.i.bf16 %v2281_v39, %v2258_v32  ;;  %v2334_v51 = vld [vmem:[#allocation1 + $0x102] ss:$16 sm:%s2333_s30]   ;;  %v2326_v53 = vsel %vm1037_vm2, %v2324_v49, %v2321_v50  ;;  %s2382_s13 = smov 12  ;;  %s2975_s16 = smov 16   ;;  %v2380_v2 = vld [vmem:[#allocation1 + $0x1] ss:$16 sm:%s2379_s12]  }
  0x88   :  { %v2337_v52 = vld [vmem:[#allocation1 + $0x102] ss:$16 sm:%s2336_s4]   ;;  %v2942_v57 = vpack.i.bf16 %v2326_v53, %v2304_v46  ;;  %v2383_v3 = vld [vmem:[#allocation1 + $0x1] ss:$16 sm:%s2382_s13]   ;;  %s2387_s17 = smov 48  ;;  %s2392_s24 = smov 192 }
  0x89   :  { %2938 = vrot.lane.b32.xlu1 %v2937_v42, %s2974_s21  ;;  %v2339_v54 = vsel %vm1029_vm0, %v2337_v52, %v2334_v51  ;;  %v2342_v55 = vld [vmem:[#allocation1 + $0x102] ss:$16 sm:%s2341_s7]   ;;  %v2385_v5 = vsel %vm1029_vm0, %v2383_v3, %v2380_v2  ;;  %v2388_v6 = vld [vmem:[#allocation1 + $0x1] ss:$16 sm:%s2387_s17]   ;;  %s2401_s25 = smov 3  ;;  %s2404_s6 = smov 12 }
  0x8a   :  { %v2347_v56 = vld [vmem:[#allocation1 + $0x102] ss:$16 sm:%s2346_s18]   ;;  %v2344_v58 = vsel %vm1033_vm1, %v2342_v55, %v2339_v54  ;;  %2943 = vrot.lane.b32.xlu0 %v2942_v57, %s2975_s16  ;;  %v2393_v7 = vld [vmem:[#allocation1 + $0x1] ss:$16 sm:%s2392_s24]   ;;  %v2390_v9 = vsel %vm1033_vm1, %v2388_v6, %v2385_v5  ;;  %s2409_s15 = smov 48  ;;  %s2414_s20 = smov 192 }
  0x8b   :  { %v2357_v59 = vld [vmem:[#allocation1 + $0x182] ss:$16 sm:%s2356_s19]   ;;  %v2349_v61 = vsel %vm1037_vm2, %v2347_v56, %v2344_v58  ;;  %v2402_v10 = vld [vmem:[#allocation1 + $0x81] ss:$16 sm:%s2401_s25]   ;;  %s2424_s2 = smov 3  ;;  %v2395_v13 = vsel %vm1037_vm2, %v2393_v7, %v2390_v9  ;;  %s2427_s3 = smov 12 }
  0x8c   :  { %v2360_v60 = vld [vmem:[#allocation1 + $0x182] ss:$16 sm:%s2359_s26]   ;;  %v2405_v11 = vld [vmem:[#allocation1 + $0x81] ss:$16 sm:%s2404_s6]   ;;  %s2432_s8 = smov 48  ;;  %s2437_s9 = smov 192 }
  0x8d   :  { %v2362_v62 = vsel %vm1029_vm0, %v2360_v60, %v2357_v59  ;;  %v2365_v63 = vld [vmem:[#allocation1 + $0x182] ss:$16 sm:%s2364_s27]   ;;  %v2410_v12 = vld [vmem:[#allocation1 + $0x81] ss:$16 sm:%s2409_s15]   ;;  %v2407_v14 = vsel %vm1029_vm0, %v2405_v11, %v2402_v10  ;;  %s2447_s10 = smov 3  ;;  %s2450_s11 = smov 12 }
  0x8e   :  { %v2370_v0 = vld [vmem:[#allocation1 + $0x182] ss:$16 sm:%s2369_s5]   ;;  %v2367_v1 = vsel %vm1033_vm1, %v2365_v63, %v2362_v62  ;;  %v2415_v15 = vld [vmem:[#allocation1 + $0x81] ss:$16 sm:%s2414_s20]   ;;  %v2412_v17 = vsel %vm1033_vm1, %v2410_v12, %v2407_v14  ;;  %s2455_s14 = smov 48  ;;  %s2460_s21 = smov 192 }
  0x8f   :  { %v2372_v4 = vsel %vm1037_vm2, %v2370_v0, %v2367_v1  ;;  %v2425_v16 = vld [vmem:[#allocation1 + $0x101] ss:$16 sm:%s2424_s2]   ;;  %v2417_v20 = vsel %vm1037_vm2, %v2415_v15, %v2412_v17  ;;  %v3424_v24 = vpop.permute.xlu1 %2823  ;;  %s1025_s22 = smov 3  ;;  %v2814_v29 = vpop.permute.xlu0 %2813  ;;  %s1027_s23 = smov 12 }
  0x90   :  { %v2947_v8 = vpack.i.bf16 %v2372_v4, %v2349_v61  ;;  %v2428_v18 = vld [vmem:[#allocation1 + $0x101] ss:$16 sm:%s2427_s3]   ;;  %v2952_v25 = vpack.i.bf16 %v2417_v20, %v2395_v13  ;;  %v1026_v33 = vld [vmem:[#allocation1] ss:$16 sm:%s1025_s22]   ;;  %s1031_s0 = smov 48  ;;  %s2976_s28 = smov 8   ;;  %v2815_v40 = vunpack.i.l.bf16 %v2814_v29  ;;  %v2825_v43 = vunpack.i.l.bf16 %v3424_v24 }
  0x91   :  { %v2433_v19 = vld [vmem:[#allocation1 + $0x101] ss:$16 sm:%s2432_s8]   ;;  %v2430_v21 = vsel %vm1029_vm0, %v2428_v18, %v2425_v16  ;;  %v1028_v35 = vld [vmem:[#allocation1] ss:$16 sm:%s1027_s23]   ;;  %s1035_s29 = smov 192  ;;  %s1042_s30 = smov 3  ;;  %v2816_v48 = vunpack.i.h.bf16 %v2814_v29  ;;  %v2826_v53 = vunpack.i.h.bf16 %v3424_v24 }
  0x92   :  { %2948 = vrot.lane.b32.xlu1 %v2947_v8, %s2975_s16  ;;  %v2438_v22 = vld [vmem:[#allocation1 + $0x101] ss:$16 sm:%s2437_s9]   ;;  %v2435_v26 = vsel %vm1033_vm1, %v2433_v19, %v2430_v21  ;;  %2953 = vrot.lane.b32.xlu0 %v2952_v25, %s2976_s28  ;;  %v1032_v36 = vld [vmem:[#allocation1] ss:$16 sm:%s1031_s0]   ;;  %v1030_v38 = vsel %vm1029_vm0, %v1028_v35, %v1026_v33  ;;  %s1045_s4 = smov 12  ;;  %s1050_s7 = smov 48 }
  0x93   :  { %v2448_v23 = vld [vmem:[#allocation1 + $0x181] ss:$16 sm:%s2447_s10]   ;;  %v2440_v30 = vsel %vm1037_vm2, %v2438_v22, %v2435_v26  ;;  %v1036_v39 = vld [vmem:[#allocation1] ss:$16 sm:%s1035_s29]   ;;  %v1034_v44 = vsel %vm1033_vm1, %v1032_v36, %v1030_v38  ;;  %s1055_s18 = smov 192  ;;  %s1063_s19 = smov 3 }
  0x94   :  { %v2451_v27 = vld [vmem:[#allocation1 + $0x181] ss:$16 sm:%s2450_s11]   ;;  %v1043_v41 = vld [vmem:[#allocation1 + $0x80] ss:$16 sm:%s1042_s30]   ;;  %v1038_v47 = vsel %vm1037_vm2, %v1036_v39, %v1034_v44  ;;  %s1066_s26 = smov 12  ;;  %s1071_s27 = smov 48 }
  0x95   :  { %v2456_v28 = vld [vmem:[#allocation1 + $0x181] ss:$16 sm:%s2455_s14]   ;;  %v2453_v31 = vsel %vm1029_vm0, %v2451_v27, %v2448_v23  ;;  %v1046_v45 = vld [vmem:[#allocation1 + $0x80] ss:$16 sm:%s1045_s4]   ;;  %1040 = vst.msk [vmem:[#allocation0] sm:$0xff] %vm1039_vm3, %v1038_v47   ;;  %s1076_s5 = smov 192 }
  0x96   :  { %v2461_v32 = vld [vmem:[#allocation1 + $0x181] ss:$16 sm:%s2460_s21]   ;;  %v2458_v34 = vsel %vm1033_vm1, %v2456_v28, %v2453_v31  ;;  %v1051_v46 = vld [vmem:[#allocation1 + $0x80] ss:$16 sm:%s1050_s7]   ;;  %v1048_v49 = vsel %vm1029_vm0, %v1046_v45, %v1043_v41  ;;  %s1084_s12 = smov 3  ;;  %1125 = vst.msk [vmem:[#allocation0] sm:$0xff] %vm1124_vm4, %v2815_v40  }
  0x97   :  { %v2463_v37 = vsel %vm1037_vm2, %v2461_v32, %v2458_v34  ;;  %v1056_v50 = vld [vmem:[#allocation1 + $0x80] ss:$16 sm:%s1055_s18]   ;;  %v1053_v54 = vsel %vm1033_vm1, %v1051_v46, %v1048_v49  ;;  %s1087_s13 = smov 12  ;;  %s1092_s16 = smov 48  ;;  %1216 = vst.msk [vmem:[#allocation0] sm:$0xff] %vm1215_vm5, %v2825_v43  }
  0x98   :  { %v2957_v42 = vpack.i.bf16 %v2463_v37, %v2440_v30  ;;  %v1064_v52 = vld [vmem:[#allocation1 + $0x100] ss:$16 sm:%s1063_s19]   ;;  %v1058_v57 = vsel %vm1037_vm2, %v1056_v50, %v1053_v54  ;;  %s1097_s17 = smov 192 }
  0x99   :  { %v1067_v55 = vld [vmem:[#allocation1 + $0x100] ss:$16 sm:%s1066_s26]   ;;  %1061 = vst.msk [vmem:[#allocation0 + $0x8] sm:$0xff] %vm1039_vm3, %v1058_v57  }
  0x9a   :  { %2958 = vrot.lane.b32.xlu1 %v2957_v42, %s2976_s28  ;;  %v1072_v56 = vld [vmem:[#allocation1 + $0x100] ss:$16 sm:%s1071_s27]   ;;  %v1069_v58 = vsel %vm1029_vm0, %v1067_v55, %v1064_v52  ;;  %1148 = vst.msk [vmem:[#allocation0 + $0x8] sm:$0xff] %vm1124_vm4, %v2816_v48  }
  0x9b   :  { %v2829_v51 = vpop.permute.xlu1 %2828  ;;  %v1077_v59 = vld [vmem:[#allocation1 + $0x100] ss:$16 sm:%s1076_s5]   ;;  %v1074_v61 = vsel %vm1033_vm1, %v1072_v56, %v1069_v58  ;;  %1239 = vst.msk [vmem:[#allocation0 + $0x8] sm:$0xff] %vm1215_vm5, %v2826_v53  }
  0x9c   :  { %v1085_v60 = vld [vmem:[#allocation1 + $0x180] ss:$16 sm:%s1084_s12]   ;;  %v2830_v0 = vunpack.i.l.bf16 %v2829_v51  ;;  %v1079_v1 = vsel %vm1037_vm2, %v1077_v59, %v1074_v61  ;;  %v2819_v2 = vpop.permute.xlu0 %2818  ;;  %v2831_v5 = vunpack.i.h.bf16 %v2829_v51 }
  0x9d   :  { %v1088_v62 = vld [vmem:[#allocation1 + $0x180] ss:$16 sm:%s1087_s13]   ;;  %1082 = vst.msk [vmem:[#allocation0 + $0x10] sm:$0xff] %vm1039_vm3, %v1079_v1   ;;  %v2821_v6 = vunpack.i.h.bf16 %v2819_v2  ;;  %v2820_v7 = vunpack.i.l.bf16 %v2819_v2 }
  0x9e   :  { %v1093_v63 = vld [vmem:[#allocation1 + $0x180] ss:$16 sm:%s1092_s16]   ;;  %v1090_v3 = vsel %vm1029_vm0, %v1088_v62, %v1085_v60  ;;  %vm2216_vm0 = vcmask 261312  }
  0x9f   :  { %v1098_v4 = vld [vmem:[#allocation1 + $0x180] ss:$16 sm:%s1097_s17]   ;;  %v1095_v8 = vsel %vm1033_vm1, %v1093_v63, %v1090_v3  ;;  %1171 = vst.msk [vmem:[#allocation0 + $0x10] sm:$0xff] %vm1124_vm4, %v2820_v7   ;;  %vm2307_vm1 = vcmask 195712  }
  0xa0   :  { %v1100_v9 = vsel %vm1037_vm2, %v1098_v4, %v1095_v8  ;;  %1262 = vst.msk [vmem:[#allocation0 + $0x10] sm:$0xff] %vm1215_vm5, %v2830_v0   ;;  %vm2398_vm2 = vcmask 130112  }
  0xa1   :  { %1103 = vst.msk [vmem:[#allocation0 + $0x18] sm:$0xff] %vm1039_vm3, %v1100_v9  }
  0xa2   :  { %1194 = vst.msk [vmem:[#allocation0 + $0x18] sm:$0xff] %vm1124_vm4, %v2821_v6   ;;  %v2839_v10 = vpop.permute.xlu1 %2838 }
  0xa3   :  { %1285 = vst.msk [vmem:[#allocation0 + $0x18] sm:$0xff] %vm1215_vm5, %v2831_v5   ;;  %v2841_v11 = vunpack.i.h.bf16 %v2839_v10  ;;  %v2840_v12 = vunpack.i.l.bf16 %v2839_v10 }
  0xa5   :  { %1353 = vst.msk [vmem:[#allocation0 + $0x10] sm:$0xff] %vm1306_vm6, %v2840_v12   ;;  %1376 = vst.msk [vmem:[#allocation0 + $0x18] sm:$0xff] %vm1306_vm6, %v2841_v11  }
  0xa7   :  { %v2849_v16 = vpop.permute.xlu1 %2848 }
  0xa8   :  { %v2834_v13 = vpop.permute.xlu0 %2833  ;;  %v2851_v17 = vunpack.i.h.bf16 %v2849_v16  ;;  %v2850_v18 = vunpack.i.l.bf16 %v2849_v16 }
  0xa9   :  { %v2836_v14 = vunpack.i.h.bf16 %v2834_v13  ;;  %v2835_v15 = vunpack.i.l.bf16 %v2834_v13 }
  0xaa   :  { %1444 = vst.msk [vmem:[#allocation0 + $0x10] sm:$0xff] %vm1397_vm7, %v2850_v18   ;;  %1467 = vst.msk [vmem:[#allocation0 + $0x18] sm:$0xff] %vm1397_vm7, %v2851_v17  }
  0xab   :  { %1330 = vst.msk [vmem:[#allocation0 + $0x8] sm:$0xff] %vm1306_vm6, %v2836_v14   ;;  %1307 = vst.msk [vmem:[#allocation0] sm:$0xff] %vm1306_vm6, %v2835_v15  }
  0xaf   :  { %v2844_v19 = vpop.permute.xlu0 %2843 }
  0xb0   :  { %v2846_v20 = vunpack.i.h.bf16 %v2844_v19  ;;  %v2845_v21 = vunpack.i.l.bf16 %v2844_v19  ;;  %v2859_v22 = vpop.permute.xlu1 %2858 }
  0xb1   :  { %v2861_v23 = vunpack.i.h.bf16 %v2859_v22  ;;  %v2860_v24 = vunpack.i.l.bf16 %v2859_v22 }
  0xb2   :  { %1398 = vst.msk [vmem:[#allocation0] sm:$0xff] %vm1397_vm7, %v2845_v21   ;;  %1421 = vst.msk [vmem:[#allocation0 + $0x8] sm:$0xff] %vm1397_vm7, %v2846_v20  }
  0xb3   :  { %1535 = vst.msk [vmem:[#allocation0 + $0x10] sm:$0xff] %vm1488_vm8, %v2860_v24   ;;  %1558 = vst.msk [vmem:[#allocation0 + $0x18] sm:$0xff] %vm1488_vm8, %v2861_v23  }
  0xb8   :  { %v2854_v25 = vpop.permute.xlu0 %2853  ;;  %v2869_v28 = vpop.permute.xlu1 %2868 }
  0xb9   :  { %v2856_v26 = vunpack.i.h.bf16 %v2854_v25  ;;  %v2855_v27 = vunpack.i.l.bf16 %v2854_v25  ;;  %v2871_v29 = vunpack.i.h.bf16 %v2869_v28  ;;  %v2870_v30 = vunpack.i.l.bf16 %v2869_v28 }
  0xbb   :  { %1489 = vst.msk [vmem:[#allocation0] sm:$0xff] %vm1488_vm8, %v2855_v27   ;;  %1512 = vst.msk [vmem:[#allocation0 + $0x8] sm:$0xff] %vm1488_vm8, %v2856_v26  }
  0xbc   :  { %1626 = vst.msk [vmem:[#allocation0 + $0x10] sm:$0xff] %vm1579_vm9, %v2870_v30   ;;  %1649 = vst.msk [vmem:[#allocation0 + $0x18] sm:$0xff] %vm1579_vm9, %v2871_v29  }
  0xc0   :  { %v2864_v31 = vpop.permute.xlu0 %2863  ;;  %v2879_v34 = vpop.permute.xlu1 %2878 }
  0xc1   :  { %v2866_v32 = vunpack.i.h.bf16 %v2864_v31  ;;  %v2865_v33 = vunpack.i.l.bf16 %v2864_v31  ;;  %v2881_v35 = vunpack.i.h.bf16 %v2879_v34  ;;  %v2880_v36 = vunpack.i.l.bf16 %v2879_v34 }
  0xc3   :  { %1580 = vst.msk [vmem:[#allocation0] sm:$0xff] %vm1579_vm9, %v2865_v33   ;;  %1603 = vst.msk [vmem:[#allocation0 + $0x8] sm:$0xff] %vm1579_vm9, %v2866_v32  }
  0xc4   :  { %1717 = vst.msk [vmem:[#allocation0 + $0x10] sm:$0xff] %vm1670_vm10, %v2880_v36   ;;  %1740 = vst.msk [vmem:[#allocation0 + $0x18] sm:$0xff] %vm1670_vm10, %v2881_v35  }
  0xc8   :  { %v2874_v37 = vpop.permute.xlu0 %2873 }
  0xc9   :  { %v2876_v38 = vunpack.i.h.bf16 %v2874_v37  ;;  %v2875_v39 = vunpack.i.l.bf16 %v2874_v37  ;;  %v2889_v40 = vpop.permute.xlu1 %2888 }
  0xca   :  { %v2891_v41 = vunpack.i.h.bf16 %v2889_v40  ;;  %v2890_v42 = vunpack.i.l.bf16 %v2889_v40 }
  0xcb   :  { %1671 = vst.msk [vmem:[#allocation0] sm:$0xff] %vm1670_vm10, %v2875_v39   ;;  %1694 = vst.msk [vmem:[#allocation0 + $0x8] sm:$0xff] %vm1670_vm10, %v2876_v38  }
  0xcc   :  { %1808 = vst.msk [vmem:[#allocation0 + $0x10] sm:$0xff] %vm1761_vm11, %v2890_v42   ;;  %1831 = vst.msk [vmem:[#allocation0 + $0x18] sm:$0xff] %vm1761_vm11, %v2891_v41  }
  0xd1   :  { %v2884_v43 = vpop.permute.xlu0 %2883 }
  0xd2   :  { %v2886_v44 = vunpack.i.h.bf16 %v2884_v43  ;;  %v2885_v45 = vunpack.i.l.bf16 %v2884_v43 }
  0xd4   :  { %1762 = vst.msk [vmem:[#allocation0] sm:$0xff] %vm1761_vm11, %v2885_v45   ;;  %1785 = vst.msk [vmem:[#allocation0 + $0x8] sm:$0xff] %vm1761_vm11, %v2886_v44  }
  0xd5   :  { %v2894_v46 = vpop.permute.xlu0 %2893 }
  0xd6   :  { %v2896_v47 = vunpack.i.h.bf16 %v2894_v46  ;;  %v2895_v48 = vunpack.i.l.bf16 %v2894_v46 }
  0xd8   :  { %1853 = vst.msk [vmem:[#allocation0] sm:$0xff] %vm1852_vm12, %v2895_v48   ;;  %1876 = vst.msk [vmem:[#allocation0 + $0x8] sm:$0xff] %vm1852_vm12, %v2896_v47  }
  0xd9   :  { %v2899_v49 = vpop.permute.xlu1 %2898 }
  0xda   :  { %v2901_v50 = vunpack.i.h.bf16 %v2899_v49  ;;  %v2900_v51 = vunpack.i.l.bf16 %v2899_v49  ;;  %v2904_v52 = vpop.permute.xlu0 %2903 }
  0xdb   :  { %v2906_v53 = vunpack.i.h.bf16 %v2904_v52  ;;  %v2905_v54 = vunpack.i.l.bf16 %v2904_v52 }
  0xdc   :  { %1899 = vst.msk [vmem:[#allocation0 + $0x10] sm:$0xff] %vm1852_vm12, %v2900_v51   ;;  %1922 = vst.msk [vmem:[#allocation0 + $0x18] sm:$0xff] %vm1852_vm12, %v2901_v50  }
  0xdd   :  { %1944 = vst.msk [vmem:[#allocation0] sm:$0xff] %vm1943_vm13, %v2905_v54   ;;  %1967 = vst.msk [vmem:[#allocation0 + $0x8] sm:$0xff] %vm1943_vm13, %v2906_v53  }
  0xe2   :  { %v2909_v55 = vpop.permute.xlu1 %2908  ;;  %v2914_v58 = vpop.permute.xlu0 %2913 }
  0xe3   :  { %v2911_v56 = vunpack.i.h.bf16 %v2909_v55  ;;  %v2910_v57 = vunpack.i.l.bf16 %v2909_v55  ;;  %v2916_v59 = vunpack.i.h.bf16 %v2914_v58  ;;  %v2915_v60 = vunpack.i.l.bf16 %v2914_v58 }
  0xe5   :  { %1990 = vst.msk [vmem:[#allocation0 + $0x10] sm:$0xff] %vm1943_vm13, %v2910_v57   ;;  %2013 = vst.msk [vmem:[#allocation0 + $0x18] sm:$0xff] %vm1943_vm13, %v2911_v56  }
  0xe6   :  { %2035 = vst.msk [vmem:[#allocation0] sm:$0xff] %vm2034_vm14, %v2915_v60   ;;  %2058 = vst.msk [vmem:[#allocation0 + $0x8] sm:$0xff] %vm2034_vm14, %v2916_v59  }
  0xea   :  { %v2919_v61 = vpop.permute.xlu1 %2918 }
  0xeb   :  { %v2921_v62 = vunpack.i.h.bf16 %v2919_v61  ;;  %v2920_v63 = vunpack.i.l.bf16 %v2919_v61  ;;  %v2924_v0 = vpop.permute.xlu0 %2923 }
  0xec   :  { %v2926_v1 = vunpack.i.h.bf16 %v2924_v0  ;;  %v2925_v2 = vunpack.i.l.bf16 %v2924_v0 }
  0xed   :  { %2081 = vst.msk [vmem:[#allocation0 + $0x10] sm:$0xff] %vm2034_vm14, %v2920_v63   ;;  %2104 = vst.msk [vmem:[#allocation0 + $0x18] sm:$0xff] %vm2034_vm14, %v2921_v62  }
  0xee   :  { %2126 = vst.msk [vmem:[#allocation0] sm:$0xff] %vm2125_vm15, %v2925_v2   ;;  %2149 = vst.msk [vmem:[#allocation0 + $0x8] sm:$0xff] %vm2125_vm15, %v2926_v1  }
  0xf3   :  { %v2929_v3 = vpop.permute.xlu1 %2928  ;;  %v2934_v6 = vpop.permute.xlu0 %2933 }
  0xf4   :  { %v2931_v4 = vunpack.i.h.bf16 %v2929_v3  ;;  %v2930_v5 = vunpack.i.l.bf16 %v2929_v3  ;;  %v2936_v7 = vunpack.i.h.bf16 %v2934_v6  ;;  %v2935_v8 = vunpack.i.l.bf16 %v2934_v6 }
  0xf6   :  { %2172 = vst.msk [vmem:[#allocation0 + $0x10] sm:$0xff] %vm2125_vm15, %v2930_v5   ;;  %2195 = vst.msk [vmem:[#allocation0 + $0x18] sm:$0xff] %vm2125_vm15, %v2931_v4  }
  0xf7   :  { %2217 = vst.msk [vmem:[#allocation0] sm:$0xff] %vm2216_vm0, %v2935_v8   ;;  %2240 = vst.msk [vmem:[#allocation0 + $0x8] sm:$0xff] %vm2216_vm0, %v2936_v7  }
  0xfb   :  { %v2939_v9 = vpop.permute.xlu1 %2938 }
  0xfc   :  { %v2941_v10 = vunpack.i.h.bf16 %v2939_v9  ;;  %v2940_v11 = vunpack.i.l.bf16 %v2939_v9  ;;  %v2944_v12 = vpop.permute.xlu0 %2943 }
  0xfd   :  { %v2946_v13 = vunpack.i.h.bf16 %v2944_v12  ;;  %v2945_v14 = vunpack.i.l.bf16 %v2944_v12 }
  0xfe   :  { %2263 = vst.msk [vmem:[#allocation0 + $0x10] sm:$0xff] %vm2216_vm0, %v2940_v11   ;;  %2286 = vst.msk [vmem:[#allocation0 + $0x18] sm:$0xff] %vm2216_vm0, %v2941_v10  }
  0xff   :  { %2308 = vst.msk [vmem:[#allocation0] sm:$0xff] %vm2307_vm1, %v2945_v14   ;;  %2331 = vst.msk [vmem:[#allocation0 + $0x8] sm:$0xff] %vm2307_vm1, %v2946_v13  }
 0x104   :  { %v2949_v15 = vpop.permute.xlu1 %2948  ;;  %v2954_v18 = vpop.permute.xlu0 %2953 }
 0x105   :  { %v2951_v16 = vunpack.i.h.bf16 %v2949_v15  ;;  %v2950_v17 = vunpack.i.l.bf16 %v2949_v15  ;;  %v2956_v19 = vunpack.i.h.bf16 %v2954_v18  ;;  %v2955_v20 = vunpack.i.l.bf16 %v2954_v18 }
 0x107   :  { %2354 = vst.msk [vmem:[#allocation0 + $0x10] sm:$0xff] %vm2307_vm1, %v2950_v17   ;;  %2377 = vst.msk [vmem:[#allocation0 + $0x18] sm:$0xff] %vm2307_vm1, %v2951_v16  }
 0x108   :  { %2399 = vst.msk [vmem:[#allocation0] sm:$0xff] %vm2398_vm2, %v2955_v20   ;;  %2422 = vst.msk [vmem:[#allocation0 + $0x8] sm:$0xff] %vm2398_vm2, %v2956_v19  }
 0x10c   :  { %v2959_v21 = vpop.permute.xlu1 %2958 }
 0x10d   :  { %v2961_v22 = vunpack.i.h.bf16 %v2959_v21  ;;  %v2960_v23 = vunpack.i.l.bf16 %v2959_v21 }
 0x10f   :  { %2445 = vst.msk [vmem:[#allocation0 + $0x10] sm:$0xff] %vm2398_vm2, %v2960_v23   ;;  %2468 = vst.msk [vmem:[#allocation0 + $0x18] sm:$0xff] %vm2398_vm2, %v2961_v22   ;;  %v2473_v24 = vld [vmem:[#allocation0] sm:$0xff]  ;;  %v2478_v25 = vld [vmem:[#allocation0 + $0x8] sm:$0xff] }
 0x110   :  { %v2758_v26 = vpack.c.bf16 %v2478_v25, %v2473_v24 }
 0x112   :  { %2759 = vst [vmem:[%s3464_s1] sm:$0xff] %v2758_v26  }
 0x116   :  { %v2484_v27 = vld [vmem:[#allocation0 + $0x10] sm:$0xff]  ;;  %v2491_v28 = vld [vmem:[#allocation0 + $0x18] sm:$0xff] }
 0x117   :  { %v2763_v29 = vpack.c.bf16 %v2491_v28, %v2484_v27 }
 0x119   :  { %2796 = vst [vmem:[%s3464_s1 + $0x8] sm:$0xff] %v2763_v29  }

// kernel: tile.18
= control target key start
LH: loop header
LB: loop body
LE: loop exit
PB: predicated region body
PF: predicated region fallthrough
CT: control target
= control target key end

     0   :  { %s28_s0 = inlined_call_operand.vmem [shape: f32[8], index: 0, kind: input, shape index: {}]   ;;  %s29_s1 = inlined_call_operand.vmem [shape: f32[16,8], index: 1, kind: output, shape index: {}]  }
   0x1   :  { %v4_v0 = vld [vmem:[%s28_s0] ss:$0 sm:$0xff] }
   0x2   :  { %5 = vst [vmem:[%s29_s1] sm:$0xff] %v4_v0  ;;  %8 = vst [vmem:[%s29_s1 + $0x8] sm:$0xff] %v4_v0 }

// kernel: tile.19
= control target key start
LH: loop header
LB: loop body
LE: loop exit
PB: predicated region body
PF: predicated region fallthrough
CT: control target
= control target key end

     0   :  { %s131_s10 = smov 120   ;;  %s132_s11 = smov 104   ;;  %vm3_vm0 = vcmask 64512   ;;  %vm9_vm1 = vcmask 1048512   ;;  %vm15_vm2 = vcmask 982912   ;;  %vm21_vm3 = vcmask 917312   ;;  %s207_s0 = inlined_call_operand.vmem [shape: f32[16,8], index: 0, kind: input, shape index: {}]   ;;  %s208_s1 = inlined_call_operand.vmem [shape: f32[1,128], index: 1, kind: output, shape index: {}]  }
   0x1   :  { %v101_v0 = vld [vmem:[%s207_s0 + $0xf] sm:$0x1]   ;;  %v103_v1 = vld [vmem:[%s207_s0 + $0xd] sm:$0x1]   ;;  %v102_v2 = vld [vmem:[%s207_s0 + $0xe] sm:$0x1]  }
   0x2   :  { %7 = vrot.lane.b32.xlu0 %v101_v0, %s131_s10  ;;  %19 = vrot.lane.b32.xlu1 %v103_v1, %s132_s11  ;;  %v104_v3 = vld [vmem:[%s207_s0 + $0xc] sm:$0x1]   ;;  %s133_s16 = smov 112   ;;  %s134_s17 = smov 96   ;;  %v105_v4 = vld [vmem:[%s207_s0 + $0xb] sm:$0x1]  }
   0x3   :  { %v106_v5 = vld [vmem:[%s207_s0 + $0xa] sm:$0x1]   ;;  %v2_v6 = vld [vmem:[%s207_s0] sm:$0x1]   ;;  %s135_s24 = smov 88   ;;  %s136_s25 = smov 80  }
   0x4   :  { %4 = vst.msk [vmem:[#allocation0] sm:$0x1] %vm3_vm0, %v2_v6   ;;  %v107_v7 = vld [vmem:[%s207_s0 + $0x9] sm:$0x1]   ;;  %v108_v8 = vld [vmem:[%s207_s0 + $0x8] sm:$0x1]  }
   0x5   :  { %s137_s30 = smov 72   ;;  %s138_s2 = smov 64   ;;  %v109_v9 = vld [vmem:[%s207_s0 + $0x7] sm:$0x1]   ;;  %v110_v10 = vld [vmem:[%s207_s0 + $0x6] sm:$0x1]  }
   0x6   :  { %13 = vrot.lane.b32.xlu0 %v102_v2, %s133_s16  ;;  %25 = vrot.lane.b32.xlu1 %v104_v3, %s134_s17  ;;  %s139_s7 = smov 56   ;;  %s140_s8 = smov 48   ;;  %v111_v11 = vld [vmem:[%s207_s0 + $0x5] sm:$0x1]   ;;  %v112_v12 = vld [vmem:[%s207_s0 + $0x4] sm:$0x1]  }
   0x7   :  { %s141_s13 = smov 40   ;;  %s142_s14 = smov 32   ;;  %v113_v13 = vld [vmem:[%s207_s0 + $0x3] sm:$0x1]   ;;  %v114_v14 = vld [vmem:[%s207_s0 + $0x2] sm:$0x1]  }
   0x8   :  { %s143_s19 = smov 24   ;;  %s144_s20 = smov 16   ;;  %v115_v15 = vld [vmem:[%s207_s0 + $0x1] sm:$0x1]   ;;  %vm27_vm4 = vcmask 851712   ;;  %vm33_vm5 = vcmask 786112  }
   0x9   :  { %s145_s0 = smov 8   ;;  %vm39_vm6 = vcmask 720512   ;;  %vm45_vm7 = vcmask 654912   ;;  %vm51_vm8 = vcmask 589312   ;;  %vm57_vm9 = vcmask 523712  }
   0xa   :  { %31 = vrot.lane.b32.xlu0 %v105_v4, %s135_s24  ;;  %37 = vrot.lane.b32.xlu1 %v106_v5, %s136_s25  ;;  %vm63_vm10 = vcmask 458112   ;;  %vm69_vm11 = vcmask 392512   ;;  %vm75_vm12 = vcmask 326912   ;;  %vm81_vm13 = vcmask 261312  }
   0xb   :  { %vm87_vm14 = vcmask 195712   ;;  %vm93_vm15 = vcmask 130112  }
   0xe   :  { %43 = vrot.lane.b32.xlu0 %v107_v7, %s137_s30  ;;  %49 = vrot.lane.b32.xlu1 %v108_v8, %s138_s2 }
  0x12   :  { %55 = vrot.lane.b32.xlu0 %v109_v9, %s139_s7  ;;  %61 = vrot.lane.b32.xlu1 %v110_v10, %s140_s8 }
  0x16   :  { %67 = vrot.lane.b32.xlu0 %v111_v11, %s141_s13  ;;  %73 = vrot.lane.b32.xlu1 %v112_v12, %s142_s14 }
  0x1a   :  { %79 = vrot.lane.b32.xlu0 %v113_v13, %s143_s19  ;;  %85 = vrot.lane.b32.xlu1 %v114_v14, %s144_s20 }
  0x1e   :  { %91 = vrot.lane.b32.xlu0 %v115_v15, %s145_s0 }
  0x74   :  { %v8_v16 = vpop.permute.xlu0 %7   ;;  %v20_v17 = vpop.permute.xlu1 %19  }
  0x75   :  { %10 = vst.msk [vmem:[#allocation0] sm:$0x1] %vm9_vm1, %v8_v16  }
  0x78   :  { %v14_v18 = vpop.permute.xlu0 %13   ;;  %v26_v19 = vpop.permute.xlu1 %25  }
  0x79   :  { %16 = vst.msk [vmem:[#allocation0] sm:$0x1] %vm15_vm2, %v14_v18  }
  0x7a   :  { %22 = vst.msk [vmem:[#allocation0] sm:$0x1] %vm21_vm3, %v20_v17  }
  0x7b   :  { %28 = vst.msk [vmem:[#allocation0] sm:$0x1] %vm27_vm4, %v26_v19  }
  0x7c   :  { %v32_v20 = vpop.permute.xlu0 %31   ;;  %v38_v21 = vpop.permute.xlu1 %37  }
  0x7d   :  { %34 = vst.msk [vmem:[#allocation0] sm:$0x1] %vm33_vm5, %v32_v20  }
  0x7e   :  { %40 = vst.msk [vmem:[#allocation0] sm:$0x1] %vm39_vm6, %v38_v21  }
  0x80   :  { %v44_v22 = vpop.permute.xlu0 %43   ;;  %v50_v23 = vpop.permute.xlu1 %49  }
  0x81   :  { %46 = vst.msk [vmem:[#allocation0] sm:$0x1] %vm45_vm7, %v44_v22  }
  0x82   :  { %52 = vst.msk [vmem:[#allocation0] sm:$0x1] %vm51_vm8, %v50_v23  }
  0x84   :  { %v56_v24 = vpop.permute.xlu0 %55   ;;  %v62_v25 = vpop.permute.xlu1 %61  }
  0x85   :  { %58 = vst.msk [vmem:[#allocation0] sm:$0x1] %vm57_vm9, %v56_v24  }
  0x86   :  { %64 = vst.msk [vmem:[#allocation0] sm:$0x1] %vm63_vm10, %v62_v25  }
  0x88   :  { %v68_v26 = vpop.permute.xlu0 %67   ;;  %v74_v27 = vpop.permute.xlu1 %73  }
  0x89   :  { %70 = vst.msk [vmem:[#allocation0] sm:$0x1] %vm69_vm11, %v68_v26  }
  0x8a   :  { %76 = vst.msk [vmem:[#allocation0] sm:$0x1] %vm75_vm12, %v74_v27  }
  0x8c   :  { %v80_v28 = vpop.permute.xlu0 %79   ;;  %v86_v29 = vpop.permute.xlu1 %85  }
  0x8d   :  { %82 = vst.msk [vmem:[#allocation0] sm:$0x1] %vm81_vm13, %v80_v28  }
  0x8e   :  { %88 = vst.msk [vmem:[#allocation0] sm:$0x1] %vm87_vm14, %v86_v29  }
  0x90   :  { %v92_v30 = vpop.permute.xlu0 %91  }
  0x91   :  { %94 = vst.msk [vmem:[#allocation0] sm:$0x1] %vm93_vm15, %v92_v30  }
  0x98   :  { %v98_v31 = vld [vmem:[#allocation0] sm:$0x1] }
  0x99   :  { %100 = vst [vmem:[%s208_s1] sm:$0x1] %v98_v31 }

// kernel: decoder_block.1
= control target key start
LH: loop header
LB: loop body
LE: loop exit
PB: predicated region body
PF: predicated region fallthrough
CT: control target
= control target key end

     0   :  { %s1984_s27 = smov 0   ;;  %s2377_s0 = inlined_call_operand.vmem [shape: bf16[2,16,32], index: 0, kind: input, shape index: {}]   ;;  %s2378_s1 = inlined_call_operand.vmem [shape: bf16[2,16,96], index: 1, kind: input, shape index: {}]   ;;  %s2379_s2 = inlined_call_operand.vmem [shape: bf16[32,256], index: 2, kind: input, shape index: {}]   ;;  %s2380_s3 = inlined_call_operand.vmem [shape: f32[1,128], index: 3, kind: input, shape index: {}]   ;;  %s2381_s4 = inlined_call_operand.vmem [shape: bf16[3,224,128], index: 4, kind: input, shape index: {}]   ;;  %s2382_s5 = inlined_call_operand.vmem [shape: f32[1,128], index: 5, kind: input, shape index: {}]   ;;  %s2383_s6 = inlined_call_operand.vmem [shape: bf16[3,128,128], index: 6, kind: input, shape index: {}]   ;;  %s2384_s7 = inlined_call_operand.vmem [shape: f32[1,128], index: 7, kind: input, shape index: {}]   ;;  %s2385_s8 = inlined_call_operand.vmem [shape: f32[2,16,128], index: 8, kind: output, shape index: {}]  }
   0x1 LB: > { %s1549_s28 = sadd.s32 4294967295, %s1934_s27   ;;  %p1553_p0 = scmp.ge.s32.totalorder %s1934_s27, 1  ;;  %s1934_s27 = sphi %s1984_s27, %s18_s27  }
   0x2   : > { %p272_p1 = scmp.lt.s32.totalorder %s1934_s27, 3 }
   0x4   : > { %p273_p2 = pnand %p1553_p0, %p272_p1 }
   0x5   : > { %v1846_v0 = vld [vmem:[%s2379_s2 + $0x4] ss:$8 sps:$4 sm:$0xff] (!%p273_p2)   ;;  %p311_p3 = scmp.lt.s32.totalorder (!%p273_p2), %s1549_s28, 1  ;;  %v1848_v1 = vld [vmem:[%s2379_s2] ss:$8 sps:$4 sm:$0xff] (!%p273_p2)   ;;  %v1936_v2 = vmov (!%p273_p2), 0   ;;  %v429_v60 = vlaneseq (!%p273_p2) }
   0x6   : > { %276 = sbr.rel (%p273_p2) target bundleno = 819 (0x333), region = 52  ;;  %418 = vmatprep.mubr.bf16.mxu0 (!%p273_p2), %v1936_v2  ;;  %731 = vmatprep.subr.bf16.mxu1 (!%p273_p2), %v1936_v2  ;;  %v1849_v3 = vld [vmem:[%s2379_s2 + $0x14] ss:$8 sps:$4 sm:$0xff] (!%p273_p2)   ;;  %v1851_v4 = vld [vmem:[%s2379_s2 + $0x10] ss:$8 sps:$4 sm:$0xff] (!%p273_p2)   ;;  %vm382_vm0 = vcmask (!%p273_p2), 261120  }
   0x7   : > { %386 = vmatprep.subr.bf16.mxu0 (!%p273_p2), %v1846_v0  ;;  %v1855_v5 = vld [vmem:[%s2381_s4 + $0x70] sm:$0xff] (!%p273_p2)   ;;  %v1853_v7 = vld [vmem:[%s2381_s4] sm:$0xff] (!%p273_p2)   ;;  %v1857_v8 = vld [vmem:[%s2381_s4 + $0x78] sm:$0xff] (!%p273_p2)   ;;  %vm327_vm1 = vcmask (!%p273_p2), 1040384   ;;  %vm328_vm2 = vsmask.f32 (!%p273_p2), 256 }
   0x8   : > { %387 = vmatpush1.bf16.msra.mxu0 (!%p273_p2), %v1848_v1  ;;  %732 = vmatpush1.bf16.msra.mxu1 (!%p273_p2), %v1855_v5  ;;  %v1854_v9 = vld [vmem:[%s2381_s4 + $0x8] sm:$0xff] (!%p273_p2)   ;;  %v1859_v10 = vld [vmem:[%s2381_s4 + $0x80] sm:$0xff] (!%p273_p2)   ;;  %v1856_v11 = vld [vmem:[%s2381_s4 + $0x10] sm:$0xff] (!%p273_p2)   ;;  %vm330_vm3 = vcmask (!%p273_p2), 782340   ;;  %vm331_vm4 = vsmask.f32 (!%p273_p2), 4352 }
   0x9   : > { %388 = vmatprep.subr.bf16.mxu0 (!%p273_p2), %v1849_v3  ;;  %733 = vmatprep.subr.bf16.mxu1 (!%p273_p2), %v1936_v2  ;;  %v1861_v12 = vld [vmem:[%s2381_s4 + $0x88] sm:$0xff] (!%p273_p2)   ;;  %v1858_v13 = vld [vmem:[%s2381_s4 + $0x18] sm:$0xff] (!%p273_p2)   ;;  %v1863_v14 = vld [vmem:[%s2381_s4 + $0x90] sm:$0xff] (!%p273_p2)   ;;  %vm337_vm6 = vsmask.f32 (!%p273_p2), 7938  ;;  %vm532_vm13 = vcmask (!%p273_p2), 781312  }
   0xa   : > { %v1860_v15 = vld [vmem:[%s2381_s4 + $0x20] sm:$0xff] (!%p273_p2)   ;;  %v1865_v16 = vld [vmem:[%s2381_s4 + $0x98] sm:$0xff] (!%p273_p2)   ;;  %v1862_v17 = vld [vmem:[%s2381_s4 + $0x28] sm:$0xff] (!%p273_p2)   ;;  %vm339_vm8 = vsmask.f32 (!%p273_p2), 7954  ;;  %vm539_vm14 = vcmask (!%p273_p2), 778240  }
   0xb   : > { %v1864_v18 = vld [vmem:[%s2381_s4 + $0x30] sm:$0xff] (!%p273_p2)   ;;  %v1866_v19 = vld [vmem:[%s2381_s4 + $0x38] sm:$0xff] (!%p273_p2)   ;;  %vm2077_vm5 = vmand (!%p273_p2), %vm327_vm1, %vm328_vm2  ;;  %vm479_vm15 = vsmask.f32 (!%p273_p2), 4368  ;;  %v430_v61 = vshrl.u32 (!%p273_p2), %v429_v60, 7 }
   0xc   : > { %389 = vmatpush1.bf16.msra.mxu0 (!%p273_p2), %v1851_v4  ;;  %734 = vmatpush1.bf16.msra.mxu1 (!%p273_p2), %v1857_v8  ;;  %v334_v23 = vld [vmem:[#allocation2] sm:$0x11] (!%p273_p2)  ;;  %vm332_vm7 = vmand (!%p273_p2), %vm330_vm3, %vm331_vm4  ;;  %v342_v32 = vld [vmem:[#allocation2 + $0x10] sm:$0x11] (!%p273_p2) }
   0xd   : > { %s2395_s28 = smov (!%p311_p3, %s1549_s28), 1  ;;  %859 = vmatprep.subr.bf16.mxu0 %v1936_v2  ;;  %735 = vmatprep.subr.bf16.mxu1 %v1936_v2  ;;  %v348_v25 = vld [vmem:[#allocation3 + $0x8] sm:$0x1]  ;;  %vm333_vm9 = vmor %vm332_vm7, %vm2077_vm5  ;;  %v1869_v33 = vld [vmem:[%s2381_s4 + $0xa8] sm:$0xff]   ;;  %v431_v62 = vadd.s32 8, %v430_v61  ;;  %v436_v63 = vand.u32 1, %v430_v61 }
   0xe   : > { %s1741_s15 = sshll.u32 %s2395_s28, 3  ;;  %v1867_v26 = vld [vmem:[%s2381_s4 + $0xa0] sm:$0xff]   ;;  %v335_v29 = vsel %vm333_vm9, 0, %v334_v23  ;;  %vm2093_vm10 = vmand %vm327_vm1, %vm337_vm6  ;;  %v1870_v36 = vld [vmem:[%s2381_s4 + $0x48] sm:$0xff]   ;;  %vm501_vm7 = vcmask 1043456   ;;  %s1743_s21 = sshll.u32 %s2395_s28, 4 }
   0xf   : > { %s315_s18 = scalar_lea.vmem %s2377_s0, %s1741_s15  ;;  %s320_s30 = scalar_lea.vmem %s2378_s1, %s1741_s15  ;;  %v1868_v27 = vld [vmem:[%s2381_s4 + $0x40] sm:$0xff]   ;;  %336 = vst [vmem:[#allocation2] sm:$0x11] %v335_v29  ;;  %vm340_vm11 = vmand %vm330_vm3, %vm339_vm8  ;;  %v349_v31 = vsel %vm2093_vm10, 0, %v348_v25  ;;  %v1871_v40 = vld [vmem:[%s2381_s4 + $0xb0] sm:$0xff]   ;;  %v443_v0 = vand.u32 1, %v431_v62 }
  0x10   : > { %v1852_v6 = vld [vmem:[%s315_s18] sm:$0xff]   ;;  %736 = vmatpush1.bf16.msra.mxu1 %v1859_v10  ;;  %vm341_vm12 = vmor %vm340_vm11, %vm2093_vm10  ;;  %350 = vst [vmem:[#allocation3 + $0x8] sm:$0x1] %v349_v31  ;;  %v1872_v42 = vld [vmem:[%s2381_s4 + $0x50] sm:$0xff]   ;;  %vm617_vm9 = vsmask.f32 7424  ;;  %s325_s24 = scalar_lea.vmem %s2385_s8, %s1743_s21 }
  0x11   : > { %1565 = vmatmul.mubr.msk.bf16.vlgmr.msra.gmra.mrb[0].mxu0 %vm382_vm0, %v1852_v6  ;;  %737 = vmatprep.subr.bf16.mxu1 %v1936_v2  ;;  %v510_v20 = vld [vmem:[%s320_s30] sm:$0xf]  ;;  %v511_v21 = vld [vmem:[%s320_s30 + $0x4] sm:$0xf]  ;;  %v343_v37 = vsel %vm341_vm12, 0, %v342_v32  ;;  %vm533_vm0 = vmand %vm532_vm13, %vm337_vm6  ;;  %vm457_vm4 = vcmp.eq.s32.totalorder %v443_v0, 0 }
  0x12   : > { %860 = vmatpush1.bf16.msra.mxu0 %v1853_v7  ;;  %v513_v24 = vshrl.u32 %v510_v20, 16  ;;  %v521_v28 = vshrl.u32 %v511_v21, 16  ;;  %v516_v35 = vshll.u32 %v510_v20, 16  ;;  %v524_v39 = vshll.u32 %v511_v21, 16  ;;  %344 = vst [vmem:[#allocation2 + $0x10] sm:$0x11] %v343_v37  ;;  %vm540_vm1 = vmand %vm539_vm14, %vm328_vm2 }
  0x13   : > { %861 = vmatprep.subr.bf16.mxu0 %v1936_v2  ;;  %v1873_v47 = vld [vmem:[%s2381_s4 + $0xb8] sm:$0xff]   ;;  %vm2130_vm3 = vmor %vm328_vm2, %vm479_vm15  ;;  %v1875_v54 = vld [vmem:[%s2381_s4 + $0xc0] sm:$0xff]   ;;  %vm456_vm2 = vcmp.eq.s32.totalorder %v436_v63, 0  ;;  %vm935_vm10 = vcmask 1046528   ;;  %vm1938_vm11 = vmmov 0  }
  0x14   : > { %738 = vmatpush1.bf16.msra.mxu1 %v1861_v12  ;;  %v515_v34 = vrot.slane %v513_v24, 7  ;;  %v523_v38 = vrot.slane %v521_v28, 7  ;;  %v1874_v49 = vld [vmem:[%s2381_s4 + $0x58] sm:$0xff]   ;;  %v1876_v55 = vld [vmem:[%s2381_s4 + $0x60] sm:$0xff]   ;;  %v1877_v56 = vld [vmem:[%s2381_s4 + $0xc8] sm:$0xff]  }
  0x15   : > { %739 = vmatprep.subr.bf16.mxu1 %v1936_v2  ;;  %v1878_v57 = vld [vmem:[%s2381_s4 + $0x68] sm:$0xff]   ;;  %v1879_v58 = vld [vmem:[%s2381_s4 + $0xd0] sm:$0xff]   ;;  %v1882_v59 = vld [vmem:[%s2381_s4 + $0xd8] sm:$0xff]  }
  0x16   : > { %862 = vmatpush1.bf16.msra.mxu0 %v1854_v9  ;;  %v518_v41 = vor.u32 %v516_v35, %v515_v34  ;;  %v519_v43 = vrot.slane %v515_v34, 4  ;;  %v526_v44 = vor.u32 %v524_v39, %v523_v38  ;;  %v528_v45 = vrot.slane %v523_v38, 4  ;;  %v534_v46 = vld [vmem:[#allocation2 + $0x4] sm:$0xf]  ;;  %v1566_v3 = vld [vmem:[%s2380_s3] ss:$0 sm:$0xff]  ;;  %vm2166_vm8 = vmand %vm501_vm7, %vm337_vm6 }
  0x17   : > { %863 = vmatprep.subr.bf16.mxu0 %v1936_v2  ;;  %vm727_vm6 = vcmask 785408   ;;  %v1889_v60 = vld [vmem:[%s2381_s4 + $0xf8] sm:$0xff]   ;;  %v1890_v61 = vld [vmem:[%s2381_s4 + $0x100] sm:$0xff]   ;;  %v1891_v62 = vld [vmem:[%s2381_s4 + $0x108] sm:$0xff]  }
  0x18   : > { %740 = vmatpush1.bf16.msra.mxu1 %v1863_v14  ;;  %v535_v48 = vsel %vm533_vm0, %v518_v41, %v534_v46  ;;  %v527_v52 = vsel %vm2130_vm3, %v519_v43, %v526_v44  ;;  %v1892_v63 = vld [vmem:[%s2381_s4 + $0x110] sm:$0xff]   ;;  %v1893_v0 = vld [vmem:[%s2381_s4 + $0x118] sm:$0xff]  }
  0x19   : > { %741 = vmatprep.subr.bf16.mxu1 %v1936_v2  ;;  %536 = vst [vmem:[#allocation2 + $0x4] sm:$0xf] %v535_v48  ;;  %v541_v51 = vld [vmem:[#allocation2 + $0x14] sm:$0x1]  ;;  %538 = vst.msk [vmem:[#allocation2 + $0xc] sm:$0xf] %vm532_vm13, %v527_v52 }
  0x1a   : > { %864 = vmatpush1.bf16.msra.mxu0 %v1856_v11  ;;  %v542_v53 = vsel %vm540_vm1, %v528_v45, %v541_v51  ;;  %v507_v23 = vld [vmem:[#allocation2 + $0x10] sm:$0x1] }
  0x1b   : > { %865 = vmatprep.subr.bf16.mxu0 %v1936_v2  ;;  %543 = vst [vmem:[#allocation2 + $0x14] sm:$0x1] %v542_v53 }
  0x1c   : > { %742 = vmatpush1.bf16.msra.mxu1 %v1865_v16 }
  0x1d   : > { %743 = vmatprep.subr.bf16.mxu1 %v1936_v2 }
  0x1e   : > { %866 = vmatpush1.bf16.msra.mxu0 %v1858_v13 }
  0x1f   : > { %867 = vmatprep.subr.bf16.mxu0 %v1936_v2 }
  0x20   : > { %744 = vmatpush1.bf16.msra.mxu1 %v1867_v26 }
  0x21   : > { %745 = vmatprep.subr.bf16.mxu1 %v1936_v2 }
  0x22   : > { %868 = vmatpush1.bf16.msra.mxu0 %v1860_v15 }
  0x23   : > { %869 = vmatprep.subr.bf16.mxu0 %v1936_v2 }
  0x24   : > { %746 = vmatpush1.bf16.msra.mxu1 %v1869_v33 }
  0x25   : > { %747 = vmatprep.subr.bf16.mxu1 %v1936_v2 }
  0x26   : > { %870 = vmatpush1.bf16.msra.mxu0 %v1862_v17 }
  0x27   : > { %871 = vmatprep.subr.bf16.mxu0 %v1936_v2 }
  0x28   : > { %748 = vmatpush1.bf16.msra.mxu1 %v1871_v40 }
  0x29   : > { %749 = vmatprep.subr.bf16.mxu1 %v1936_v2 }
  0x2a   : > { %872 = vmatpush1.bf16.msra.mxu0 %v1864_v18  ;;  %v503_v18 = vld [vmem:[#allocation2] sm:$0xf] }
  0x2b   : > { %873 = vmatprep.subr.bf16.mxu0 %v1936_v2 }
  0x2c   : > { %750 = vmatpush1.bf16.msra.mxu1 %v1873_v47 }
  0x2d   : > { %751 = vmatprep.subr.bf16.mxu1 %v1936_v2 }
  0x2e   : > { %874 = vmatpush1.bf16.msra.mxu0 %v1866_v19 }
  0x2f   : > { %875 = vmatprep.subr.bf16.mxu0 %v1936_v2 }
  0x30   : > { %752 = vmatpush1.bf16.msra.mxu1 %v1875_v54  ;;  %v1885_v54 = vld [vmem:[%s2381_s4 + $0xe0] sm:$0xff]  }
  0x31   : > { %753 = vmatprep.subr.bf16.mxu1 %v1936_v2 }
  0x32   : > { %876 = vmatpush1.bf16.msra.mxu0 %v1868_v27 }
  0x33   : > { %877 = vmatprep.subr.bf16.mxu0 %v1936_v2 }
  0x34   : > { %754 = vmatpush1.bf16.msra.mxu1 %v1877_v56 }
  0x35   : > { %755 = vmatprep.subr.bf16.mxu1 %v1936_v2 }
  0x36   : > { %878 = vmatpush1.bf16.msra.mxu0 %v1870_v36 }
  0x37   : > { %879 = vmatprep.subr.bf16.mxu0 %v1936_v2 }
  0x38   : > { %756 = vmatpush1.bf16.msra.mxu1 %v1879_v58  ;;  %v1887_v58 = vld [vmem:[%s2381_s4 + $0xe8] sm:$0xff]  }
  0x39   : > { %757 = vmatprep.subr.bf16.mxu1 %v1936_v2 }
  0x3a   : > { %880 = vmatpush1.bf16.msra.mxu0 %v1872_v42 }
  0x3b   : > { %881 = vmatprep.subr.bf16.mxu0 %v1936_v2 }
  0x3c   : > { %758 = vmatpush1.bf16.msra.mxu1 %v1882_v59  ;;  %v1888_v59 = vld [vmem:[%s2381_s4 + $0xf0] sm:$0xff]  }
  0x3d   : > { %1030 = vmatprep.subr.bf16.mxu1 %v1936_v2 }
  0x3e   : > { %882 = vmatpush1.bf16.msra.mxu0 %v1874_v49 }
  0x3f   : > { %883 = vmatprep.subr.bf16.mxu0 %v1936_v2 }
  0x42   : > { %884 = vmatpush1.bf16.msra.mxu0 %v1876_v55 }
  0x43   : > { %885 = vmatprep.subr.bf16.mxu0 %v1936_v2 }
  0x46   : > { %886 = vmatpush1.bf16.msra.mxu0 %v1878_v57 }
  0xe4   : > { %v420_v1 = vpop.f32.mrb[0].mxu0 }
  0xe5   : > { %v422_v4 = vpop.f32.mrb[1].mxu0 }
  0xe6   : > { %v462_v5 = vsel %vm456_vm2, %v420_v1, %v422_v4  ;;  %v424_v6 = vpop.f32.mrb[2].mxu0  ;;  %v1894_v1 = vld [vmem:[%s2381_s4 + $0x120] sm:$0xff]   ;;  %v1896_v4 = vld [vmem:[%s2381_s4 + $0x130] sm:$0xff]  }
  0xe7   : > { %v471_v7 = vadd.f32 %v1566_v3, %v462_v5  ;;  %v426_v8 = vpop.f32.mrb[3].mxu0  ;;  %v1897_v5 = vld [vmem:[%s2381_s4 + $0x138] sm:$0xff]  }
  0xe8   : > { %v463_v9 = vsel %vm457_vm4, %v424_v6, %v426_v8  ;;  %v1898_v6 = vld [vmem:[%s2381_s4 + $0x140] sm:$0xff]   ;;  %v1899_v8 = vld [vmem:[%s2381_s4 + $0x148] sm:$0xff]  }
  0xe9   : > { %v1744_v10 = vpack.c.bf16 %v471_v7, %v471_v7  ;;  %v472_v11 = vadd.f32 %v1566_v3, %v463_v9  ;;  %v1895_v3 = vld [vmem:[%s2381_s4 + $0x128] sm:$0xff]  }
  0xeb   : > { %v482_v12 = vshrl.u32 %v1744_v10, 16  ;;  %v1745_v13 = vpack.c.bf16 %v472_v11, %v472_v11  ;;  %v485_v15 = vshll.u32 %v1744_v10, 16 }
  0xed   : > { %v484_v14 = vrot.slane %v482_v12, 7  ;;  %v490_v16 = vshrl.u32 %v1745_v13, 16  ;;  %v493_v21 = vshll.u32 %v1745_v13, 16  ;;  %v345_v12 = vld [vmem:[#allocation3] sm:$0x1]  ;;  %v1937_v13 = vmov 0.0  }
  0xee   : > { %1775 = vmatprep.subr.bf16.mxu0 %v1937_v13 }
  0xef   : > { %v487_v19 = vor.u32 %v485_v15, %v484_v14  ;;  %v492_v20 = vrot.slane %v490_v16, 7  ;;  %v488_v24 = vrot.slane %v484_v14, 4  ;;  %v346_v14 = vsel %vm2077_vm5, 0, %v345_v12  ;;  %v1902_v15 = vld [vmem:[%s2383_s6 + $0x40] sm:$0xff]   ;;  %v1903_v16 = vld [vmem:[%s2383_s6 + $0x88] sm:$0xff]  }
  0xf0   : > { %347 = vst [vmem:[#allocation3] sm:$0x1] %v346_v14 }
  0xf1   : > { %v504_v25 = vsel %vm2166_vm8, %v487_v19, %v503_v18  ;;  %v495_v26 = vor.u32 %v493_v21, %v492_v20  ;;  %v497_v27 = vrot.slane %v492_v20, 4  ;;  %v1904_v18 = vld [vmem:[%s2383_s6 + $0x48] sm:$0xff]   ;;  %v1905_v19 = vld [vmem:[%s2383_s6 + $0x90] sm:$0xff]   ;;  %v1907_v21 = vld [vmem:[%s2383_s6 + $0x98] sm:$0xff]  }
  0xf2   : > { %505 = vst [vmem:[#allocation2] sm:$0xf] %v504_v25  ;;  %v1906_v20 = vld [vmem:[%s2383_s6 + $0x50] sm:$0xff]   ;;  %v1910_v25 = vld [vmem:[%s2383_s6 + $0x60] sm:$0xff]  }
  0xf3   : > { %v496_v28 = vsel %vm2130_vm3, %v488_v24, %v495_v26  ;;  %v508_v29 = vsel %vm2077_vm5, %v497_v27, %v507_v23  ;;  %v1908_v23 = vld [vmem:[%s2383_s6 + $0x58] sm:$0xff]   ;;  %v1909_v24 = vld [vmem:[%s2383_s6 + $0xa0] sm:$0xff]   ;;  %v1911_v26 = vld [vmem:[%s2383_s6 + $0xa8] sm:$0xff]  }
  0xf4   : > { %506 = vst [vmem:[#allocation2 + $0x8] sm:$0xf] %v496_v28  ;;  %509 = vst [vmem:[#allocation2 + $0x10] sm:$0x1] %v508_v29  ;;  %v1912_v27 = vld [vmem:[%s2383_s6 + $0x68] sm:$0xff]   ;;  %v1913_v28 = vld [vmem:[%s2383_s6 + $0xb0] sm:$0xff]  }
  0xf5   : > { %v1914_v29 = vld [vmem:[%s2383_s6 + $0x70] sm:$0xff]  }
  0xf9   : > { %v544_v30 = vld [vmem:[#allocation2] sm:$0xff] }
  0xfa   : > { %v2182_v37 = vld [vmem:[#allocation2] sm:$0xee] }
  0xfb   : > { %v2176_v31 = vld [vmem:[#allocation2 + $0x8] sm:$0xff]  ;;  %v574_v32 = vld [vmem:[#allocation2 + $0x10] sm:$0x11] }
  0xfc   : > { %v1598_v33 = vcombine.high %v544_v30, %v2176_v31  ;;  %v1597_v34 = vcombine.low %v544_v30, %v2176_v31  ;;  %v1600_v35 = vcombine.high %v574_v32, %v574_v32  ;;  %v2180_v36 = vcombine.low %v574_v32, %v574_v32  ;;  %v1915_v30 = vld [vmem:[%s2383_s6 + $0xb8] sm:$0xff]  }
  0xfd   : > { %v1660_v40 = vcombine.high %v2182_v37, %v2176_v31  ;;  %v1659_v7 = vcombine.low %v2182_v37, %v2176_v31  ;;  %v1916_v31 = vld [vmem:[%s2383_s6 + $0x78] sm:$0xff]  }
  0xfe   : > { %1630 = vmatprep.mubr.msk.bf16.mxu0 %vm727_vm6, %v1598_v33  ;;  %v633_v38 = vshll.u32 %v1598_v33, 16  ;;  %v638_v39 = vshll.u32 %v1600_v35, 16  ;;  %v621_v41 = vshll.u32 %v1597_v34, 16  ;;  %v626_v42 = vshll.u32 %v2180_v36, 16 }
  0xff   : > { %892 = vmatmul.mubr.bf16.vlgmr.msra.gmra.mrb[4].mxu0 %v1597_v34  ;;  %v631_v43 = vshrl.u32 %v1598_v33, 16  ;;  %v619_v45 = vshrl.u32 %v1597_v34, 16  ;;  %v939_v49 = vrot.slane %v1660_v40, 1  ;;  %v940_v51 = vrot.slane %v1600_v35, 1 }
 0x100   : > { %v635_v44 = vrot.slane %v633_v38, 1  ;;  %v623_v46 = vrot.slane %v621_v41, 1  ;;  %v640_v48 = vrot.slane %v638_v39, 1  ;;  %v628_v53 = vrot.slane %v626_v42, 1  ;;  %1776 = vmatpush3.bf16.msra.mxu0 %v1902_v15  ;;  %1791 = vmatprep.mubr.msk.bf16.mxu0 %vm1938_vm11, %v1937_v13 }
 0x101   : > { %v941_v57 = vsel %vm935_vm10, %v939_v49, %v940_v51  ;;  %v936_v9 = vrot.slane %v1659_v7, 1  ;;  %v937_v10 = vrot.slane %v2180_v36, 1  ;;  %1777 = vmatprep.subr.bf16.mxu0 %v1937_v13 }
 0x102   : > { %v636_v47 = vor.u32 %v635_v44, %v631_v43  ;;  %v624_v52 = vor.u32 %v623_v46, %v619_v45  ;;  %v1676_v43 = vld [vmem:[%s2382_s5] ss:$0 sm:$0xff] }
 0x103   : > { %v938_v11 = vsel %vm935_vm10, %v936_v9, %v937_v10 }
 0x104   : > { %v641_v55 = vsel %vm617_vm9, %v636_v47, %v640_v48  ;;  %v629_v56 = vsel %vm617_vm9, %v624_v52, %v628_v53  ;;  %1778 = vmatpush3.bf16.msra.mxu0 %v1904_v18 }
 0x105   : > { %1615 = vmatprep.mubr.msk.bf16.mxu1 %vm727_vm6, %v641_v55  ;;  %1779 = vmatprep.subr.bf16.mxu0 %v1937_v13 }
 0x106   : > { %764 = vmatmul.mubr.bf16.vlgmr.msra.gmra.mrb[0].mxu1 %v629_v56 }
 0x107   : > { %1031 = vmatpush1.bf16.msra.mxu1 %v1885_v54  ;;  %1675 = vmatprep.mubr.msk.bf16.mxu1 %vm727_vm6, %v941_v57 }
 0x108   : > { %1032 = vmatprep.subr.bf16.mxu1 %v1936_v2  ;;  %1780 = vmatpush3.bf16.msra.mxu0 %v1906_v20 }
 0x109   : > { %1781 = vmatprep.subr.bf16.mxu0 %v1937_v13 }
 0x10b   : > { %1033 = vmatpush1.bf16.msra.mxu1 %v1887_v58 }
 0x10c   : > { %1034 = vmatprep.subr.bf16.mxu1 %v1936_v2  ;;  %1782 = vmatpush3.bf16.msra.mxu0 %v1908_v23 }
 0x10d   : > { %1783 = vmatprep.subr.bf16.mxu0 %v1937_v13 }
 0x10f   : > { %1035 = vmatpush1.bf16.msra.mxu1 %v1888_v59 }
 0x110   : > { %1036 = vmatprep.subr.bf16.mxu1 %v1936_v2  ;;  %1784 = vmatpush3.bf16.msra.mxu0 %v1910_v25  ;;  %v1922_v25 = vld [vmem:[%s2383_s6 + $0x10] sm:$0xff]  }
 0x111   : > { %1785 = vmatprep.subr.bf16.mxu0 %v1937_v13 }
 0x113   : > { %1037 = vmatpush1.bf16.msra.mxu1 %v1889_v60  ;;  %v1110_v60 = vld [vmem:[#allocation3] sm:$0xf] }
 0x114   : > { %1038 = vmatprep.subr.bf16.mxu1 %v1936_v2  ;;  %1786 = vmatpush3.bf16.msra.mxu0 %v1912_v27  ;;  %v1924_v27 = vld [vmem:[%s2383_s6 + $0x20] sm:$0xff]  }
 0x115   : > { %1787 = vmatprep.subr.bf16.mxu0 %v1937_v13 }
 0x117   : > { %1039 = vmatpush1.bf16.msra.mxu1 %v1890_v61 }
 0x118   : > { %1040 = vmatprep.subr.bf16.mxu1 %v1936_v2  ;;  %1788 = vmatpush3.bf16.msra.mxu0 %v1914_v29  ;;  %v1926_v29 = vld [vmem:[%s2383_s6 + $0x30] sm:$0xff]  }
 0x119   : > { %1789 = vmatprep.subr.bf16.mxu0 %v1937_v13 }
 0x11b   : > { %1041 = vmatpush1.bf16.msra.mxu1 %v1891_v62 }
 0x11c   : > { %1042 = vmatprep.subr.bf16.mxu1 %v1936_v2  ;;  %1790 = vmatpush3.bf16.msra.mxu0 %v1916_v31 }
 0x11d   : > { %1795 = vmatprep.subr.bf16.mxu0 %v1937_v13 }
 0x11f   : > { %1043 = vmatpush1.bf16.msra.mxu1 %v1892_v63 }
 0x120   : > { %1044 = vmatprep.subr.bf16.mxu1 %v1936_v2 }
 0x123   : > { %1045 = vmatpush1.bf16.msra.mxu1 %v1893_v0  ;;  %v1114_v0 = vld [vmem:[#allocation3 + $0x8] sm:$0x1] }
 0x124   : > { %1046 = vmatprep.subr.bf16.mxu1 %v1936_v2 }
 0x127   : > { %1047 = vmatpush1.bf16.msra.mxu1 %v1894_v1 }
 0x128   : > { %1048 = vmatprep.subr.bf16.mxu1 %v1936_v2 }
 0x12b   : > { %1049 = vmatpush1.bf16.msra.mxu1 %v1895_v3 }
 0x12c   : > { %1050 = vmatprep.subr.bf16.mxu1 %v1936_v2 }
 0x12f   : > { %1051 = vmatpush1.bf16.msra.mxu1 %v1896_v4 }
 0x130   : > { %1052 = vmatprep.subr.bf16.mxu1 %v1936_v2 }
 0x133   : > { %1053 = vmatpush1.bf16.msra.mxu1 %v1897_v5 }
 0x134   : > { %1054 = vmatprep.subr.bf16.mxu1 %v1936_v2 }
 0x137   : > { %1055 = vmatpush1.bf16.msra.mxu1 %v1898_v6 }
 0x138   : > { %1056 = vmatprep.subr.bf16.mxu1 %v1936_v2  ;;  %v1901_v2 = vld [vmem:[%s2383_s6 + $0x80] sm:$0xff]  }
 0x13b   : > { %1057 = vmatpush1.bf16.msra.mxu1 %v1899_v8 }
 0x13c   : > { %1815 = vmatprep.subr.bf16.mxu1 %v1937_v13 }
 0x13e   : > { %1063 = vmatmul.mubr.bf16.vlgmr.msra.gmra.mrb[4].mxu1 %v938_v11 }
 0x13f   : > { %1816 = vmatpush3.bf16.msra.mxu1 %v1901_v2  ;;  %1831 = vmatprep.mubr.msk.bf16.mxu1 %vm1938_vm11, %v1937_v13 }
 0x140   : > { %1817 = vmatprep.subr.bf16.mxu1 %v1937_v13 }
 0x143   : > { %1818 = vmatpush3.bf16.msra.mxu1 %v1903_v16 }
 0x144   : > { %1819 = vmatprep.subr.bf16.mxu1 %v1937_v13 }
 0x147   : > { %1820 = vmatpush3.bf16.msra.mxu1 %v1905_v19 }
 0x148   : > { %1821 = vmatprep.subr.bf16.mxu1 %v1937_v13 }
 0x14b   : > { %1822 = vmatpush3.bf16.msra.mxu1 %v1907_v21  ;;  %v1920_v21 = vld [vmem:[%s2383_s6] sm:$0xff]  }
 0x14c   : > { %1823 = vmatprep.subr.bf16.mxu1 %v1937_v13 }
 0x14f   : > { %1824 = vmatpush3.bf16.msra.mxu1 %v1909_v24  ;;  %v1921_v24 = vld [vmem:[%s2383_s6 + $0x8] sm:$0xff]  }
 0x150   : > { %1825 = vmatprep.subr.bf16.mxu1 %v1937_v13 }
 0x153   : > { %1826 = vmatpush3.bf16.msra.mxu1 %v1911_v26  ;;  %v1923_v26 = vld [vmem:[%s2383_s6 + $0x18] sm:$0xff]  }
 0x154   : > { %1827 = vmatprep.subr.bf16.mxu1 %v1937_v13 }
 0x157   : > { %1828 = vmatpush3.bf16.msra.mxu1 %v1913_v28  ;;  %v1925_v28 = vld [vmem:[%s2383_s6 + $0x28] sm:$0xff]  }
 0x158   : > { %1829 = vmatprep.subr.bf16.mxu1 %v1937_v13 }
 0x15b   : > { %1830 = vmatpush3.bf16.msra.mxu1 %v1915_v30  ;;  %v1927_v30 = vld [vmem:[%s2383_s6 + $0x38] sm:$0xff]  }
 0x1d2   : > { %v893_v32 = vpop.f32.mrb[4].mxu0 }
 0x1d3   : > { %v895_v33 = vpop.f32.mrb[5].mxu0 }
 0x1d4   : > { %v896_v34 = vpop.f32.mrb[6].mxu0 }
 0x1d5   : > { %v898_v35 = vpop.f32.mrb[7].mxu0 }
 0x1d9   : > { %v765_v36 = vpop.f32.mrb[0].mxu1 }
 0x1da   : > { %v894_v37 = vadd.f32 %v893_v32, %v765_v36  ;;  %v767_v38 = vpop.f32.mrb[1].mxu1 }
 0x1db   : > { %v768_v39 = vpop.f32.mrb[2].mxu1 }
 0x1dc   : > { %v897_v40 = vadd.f32 %v896_v34, %v768_v39  ;;  %v770_v41 = vpop.f32.mrb[3].mxu1 }
 0x211   : > { %v1064_v42 = vpop.f32.mrb[4].mxu1 }
 0x212   : > { %v1071_v44 = vadd.f32 %v1064_v42, %v894_v37  ;;  %v1066_v45 = vpop.f32.mrb[5].mxu1  ;;  %v1738_v42 = vld [vmem:[%s2384_s7] ss:$0 sm:$0xff] }
 0x213   : > { %v1067_v46 = vpop.f32.mrb[6].mxu1 }
 0x214   : > { %v1080_v47 = vadd.f32 %v1676_v43, %v1071_v44  ;;  %v1072_v48 = vadd.f32 %v1067_v46, %v897_v40  ;;  %v1069_v49 = vpop.f32.mrb[7].mxu1 }
 0x216   : > { %v1082_v51 = vmax.f32 %v1080_v47, 0.0  ;;  %v1081_v52 = vadd.f32 %v1676_v43, %v1072_v48 }
 0x218   : > { %v1746_v53 = vpack.c.bf16 %v1082_v51, %v1082_v51  ;;  %v1083_v54 = vmax.f32 %v1081_v52, 0.0 }
 0x21a   : > { %v1091_v55 = vshrl.u32 %v1746_v53, 16  ;;  %v1747_v56 = vpack.c.bf16 %v1083_v54, %v1083_v54  ;;  %v1094_v58 = vshll.u32 %v1746_v53, 16 }
 0x21c   : > { %v1093_v57 = vrot.slane %v1091_v55, 7  ;;  %v1099_v59 = vshrl.u32 %v1747_v56, 16  ;;  %v1102_v63 = vshll.u32 %v1747_v56, 16 }
 0x21e   : > { %v1096_v61 = vor.u32 %v1094_v58, %v1093_v57  ;;  %v1101_v62 = vrot.slane %v1099_v59, 7  ;;  %v1097_v1 = vrot.slane %v1093_v57, 4 }
 0x220   : > { %v1111_v3 = vsel %vm2166_vm8, %v1096_v61, %v1110_v60  ;;  %v1104_v4 = vor.u32 %v1102_v63, %v1101_v62  ;;  %v1106_v5 = vrot.slane %v1101_v62, 4 }
 0x221   : > { %1112 = vst [vmem:[#allocation3] sm:$0xf] %v1111_v3 }
 0x222   : > { %v1105_v6 = vsel %vm2130_vm3, %v1097_v1, %v1104_v4  ;;  %v1115_v7 = vsel %vm2077_vm5, %v1106_v5, %v1114_v0 }
 0x223   : > { %1113 = vst [vmem:[#allocation3 + $0x4] sm:$0xf] %v1105_v6  ;;  %1116 = vst [vmem:[#allocation3 + $0x8] sm:$0x1] %v1115_v7 }
 0x228   : > { %v1117_v8 = vld [vmem:[#allocation3] sm:$0xf] }
 0x229   : > { %v1353_v10 = vld [vmem:[#allocation3] sm:$0xe] }
 0x22a   : > { %v1118_v9 = vld [vmem:[#allocation3 + $0x4] sm:$0xf]  ;;  %v1918_v12 = vld [vmem:[#allocation3 + $0x8] ss:$0 sps:$4 sm:$0x11]  }
 0x22b   : > { %v1695_v11 = vcombine.low %v1117_v8, %v1118_v9  ;;  %v1729_v14 = vcombine.low %v1353_v10, %v1118_v9  ;;  %v1375_v17 = vrot.slane %v1918_v12, 1  ;;  %v1169_v16 = vshll.u32 %v1918_v12, 16 }
 0x22d   : > { %v1374_v2 = vrot.slane %v1729_v14, 1  ;;  %v1164_v15 = vshll.u32 %v1695_v11, 16  ;;  %v1162_v19 = vshrl.u32 %v1695_v11, 16  ;;  %v1171_v22 = vrot.slane %v1169_v16, 1 }
 0x22f   : > { %v1376_v18 = vsel %vm935_vm10, %v1374_v2, %v1375_v17  ;;  %v1166_v50 = vrot.slane %v1164_v15, 1 }
 0x230   : > { %1832 = vmatmul.mubr.bf16.vlgmr.msra.gmra.mrb[8].mxu1 %v1376_v18 }
 0x231   : > { %v1167_v20 = vor.u32 %v1166_v50, %v1162_v19 }
 0x233   : > { %v1172_v23 = vsel %vm617_vm9, %v1167_v20, %v1171_v22 }
 0x234   : > { %1792 = vmatmul.mubr.bf16.vlgmr.msra.gmra.mrb[8].mxu0 %v1172_v23 }
 0x235   : > { %1796 = vmatpush3.bf16.msra.mxu0 %v1920_v21  ;;  %1811 = vmatprep.mubr.msk.bf16.mxu0 %vm1938_vm11, %v1937_v13 }
 0x236   : > { %1797 = vmatprep.subr.bf16.mxu0 %v1937_v13 }
 0x239   : > { %1798 = vmatpush3.bf16.msra.mxu0 %v1921_v24 }
 0x23a   : > { %1799 = vmatprep.subr.bf16.mxu0 %v1937_v13 }
 0x23d   : > { %1800 = vmatpush3.bf16.msra.mxu0 %v1922_v25 }
 0x23e   : > { %1801 = vmatprep.subr.bf16.mxu0 %v1937_v13 }
 0x241   : > { %1802 = vmatpush3.bf16.msra.mxu0 %v1923_v26 }
 0x242   : > { %1803 = vmatprep.subr.bf16.mxu0 %v1937_v13 }
 0x245   : > { %1804 = vmatpush3.bf16.msra.mxu0 %v1924_v27 }
 0x246   : > { %1805 = vmatprep.subr.bf16.mxu0 %v1937_v13 }
 0x249   : > { %1806 = vmatpush3.bf16.msra.mxu0 %v1925_v28 }
 0x24a   : > { %1807 = vmatprep.subr.bf16.mxu0 %v1937_v13 }
 0x24d   : > { %1808 = vmatpush3.bf16.msra.mxu0 %v1926_v29 }
 0x24e   : > { %1809 = vmatprep.subr.bf16.mxu0 %v1937_v13 }
 0x251   : > { %1810 = vmatpush3.bf16.msra.mxu0 %v1927_v30 }
 0x254   : > { %1812 = vmatmul.mubr.bf16.vlgmr.msra.gmra.mrb[12].mxu0 %v1695_v11 }
 0x303   : > { %v1460_v31 = vpop.f32.mrb[8].mxu1 }
 0x304   : > { %v1833_v32 = vpop.f32.mrb[9].mxu1 }
 0x305   : > { %v1463_v33 = vpop.f32.mrb[10].mxu1 }
 0x306   : > { %v1834_v34 = vpop.f32.mrb[11].mxu1 }
 0x307   : > { %v1256_v35 = vpop.f32.mrb[8].mxu0 }
 0x308   : > { %v1793_v36 = vpop.f32.mrb[9].mxu0 }
 0x309   : > { %v1259_v37 = vpop.f32.mrb[10].mxu0 }
 0x30a   : > { %v1794_v38 = vpop.f32.mrb[11].mxu0 }
 0x327   : > { %v1346_v39 = vpop.f32.mrb[12].mxu0 }
 0x328   : > { %v1347_v40 = vadd.f32 %v1346_v39, %v1256_v35  ;;  %v1813_v41 = vpop.f32.mrb[13].mxu0 }
 0x329   : > { %v1349_v43 = vpop.f32.mrb[14].mxu0 }
 0x32a   : > { %v1467_v13 = vadd.f32 %v1460_v31, %v1347_v40  ;;  %v1350_v44 = vadd.f32 %v1349_v43, %v1259_v37  ;;  %v1814_v45 = vpop.f32.mrb[15].mxu0 }
 0x32c   : > { %v1476_v46 = vadd.f32 %v1738_v42, %v1467_v13  ;;  %v1468_v47 = vadd.f32 %v1463_v33, %v1350_v44 }
 0x32e   : > { %v1478_v48 = vmax.f32 %v1476_v46, 0.0  ;;  %v1477_v49 = vadd.f32 %v1738_v42, %v1468_v47 }
 0x330   : > { %1480 = vst [vmem:[%s325_s24] sm:$0xff] %v1478_v48  ;;  %v1479_v51 = vmax.f32 %v1477_v49, 0.0 }
 0x332   : > { %1481 = vst [vmem:[%s325_s24 + $0x8] sm:$0xff] %v1479_v51 }
 0x333 PF: > { %s18_s27 = sadd.s32 1, %s1934_s27  }
 0x334   : > { %p15_p4 = scmp.ge.s32.totalorder %s18_s27, 4  }
 0x336   :  { %17 = sbr.rel (!%p15_p4) target bundleno = 1 (0x1), region = 89 }

</bundles_post_ra>
